<compile_context>
chip_gen: v5e
topology: v5e:2x2
jax: 0.10.0
libtpu: 0.0.40
codegen_flags: <defaults>
</compile_context>

<pallas_src>
import functools

import jax
import jax.numpy as jnp
from jax.experimental import pallas as pl
from jax.experimental.pallas import tpu as pltpu

# ---------------- model hyperparameters (small, consistent with the module) ----------
EMB = 32          # state dimension e
N_AGENTS = 3
HEADS = 2
DEPTH = 2
SEQ_LEN = 8       # t
BATCH = 2
COMP_EMB = int(1.5 * EMB // N_AGENTS)   # = 16 (matches int(1.5*emb//n_agents))
FF_HIDDEN = 4 * COMP_EMB                # pbloem TransformerBlock: ff_hidden_mult=4
LANE = 128                              # slab lane width (dense, aligned DMA)


def _layernorm(x, g, b, eps=1e-5):
    mu = jnp.mean(x, axis=-1, keepdims=True)
    var = jnp.mean((x - mu) ** 2, axis=-1, keepdims=True)
    return (x - mu) * jax.lax.rsqrt(var + eps) * g + b


def _time_transformer_kernel(x_ref, slab_ref, out_t_ref, out_e_ref,
                             *, depth, heads, offs):
    # x_ref: (ROWS, E) with ROWS = B batches * T timesteps folded onto sublanes.
    # slab_ref: (R, 128) packed operand slab; every entry is rows [r0, r0+nr),
    #           lanes [0, nc)  (row offsets 8-aligned, lane start always 0).
    def ld(name):
        r0, nr, nc = offs[name]
        return slab_ref[r0:r0 + nr, :nc]

    # compress_input(x) + positional embedding (pos pre-tiled per folded batch).
    h = (jnp.dot(x_ref[...], ld("wc"), preferred_element_type=jnp.float32)
         + ld("bc") + ld("pos"))                                    # (ROWS, C)

    bias = ld("bias")   # (ROWS, ROWS) block-diagonal causal bias (0 / -1e30), precomputed

    for d in range(depth):
        attn = ld(f"bu{d}")                                         # (1, C), broadcasts
        for hh in range(heads):
            # Per-head projections: each output starts at lane 0 -> no lane slicing.
            # (1/sqrt(C) attention scale is pre-folded into Wq in the wrapper.)
            q = jnp.dot(h, ld(f"wq{d}_{hh}"), preferred_element_type=jnp.float32)
            k = jnp.dot(h, ld(f"wk{d}_{hh}"), preferred_element_type=jnp.float32)
            v = jnp.dot(h, ld(f"wv{d}_{hh}"), preferred_element_type=jnp.float32)
            # q @ k^T via transposed contraction (no explicit transpose op).
            s = jnp.einsum("rc,sc->rs", q, k,
                           preferred_element_type=jnp.float32) + bias
            m = jnp.max(s, axis=-1, keepdims=True)
            p = jnp.exp(s - m)
            denom = jnp.sum(p, axis=-1, keepdims=True)
            p = p * pl.reciprocal(denom, approx=True)               # EUP reciprocal
            o = jnp.dot(p, v, preferred_element_type=jnp.float32)   # (ROWS, C)
            # Unify heads by per-head matmul accumulation (no lane concat).
            attn = attn + jnp.dot(o, ld(f"wu{d}_{hh}"),
                                  preferred_element_type=jnp.float32)

        h = _layernorm(attn + h, ld(f"ln1g{d}"), ld(f"ln1b{d}"))     # norm1
        z = jnp.dot(h, ld(f"w1{d}"), preferred_element_type=jnp.float32) + ld(f"b1{d}")
        z = jnp.maximum(z, 0.0)
        z = jnp.dot(z, ld(f"w2{d}"), preferred_element_type=jnp.float32) + ld(f"b2{d}")
        h = _layernorm(z + h, ld(f"ln2g{d}"), ld(f"ln2b{d}"))        # norm2
        # TODO(synk): nn.Dropout(dropout=0.0) is an identity at inference; omitted.

    # Lane-dense (1, ROWS) time-wise row straight from the MXU (no transpose).
    r = jnp.einsum("oc,rc->or", ld("wr"), h,
                   preferred_element_type=jnp.float32) + ld("br")    # (1, ROWS)
    out_t_ref[...] = r
    # Episode sum fused in the epilogue: seg[b, row] = 1 iff row belongs to batch b.
    # (br is already folded into every time entry of r, so the sum is exact.)
    out_e_ref[...] = jnp.einsum("or,br->ob", r, ld("seg"),
                                preferred_element_type=jnp.float32)  # (1, B)


def _pack_slab(entries):
    """Pack 2-D f32 operands into one (R, 128) slab: rows 8-aligned, lanes start at 0."""
    offs, blocks, cur = {}, [], 0
    for name, a in entries:
        a = jnp.asarray(a, jnp.float32)
        r, c = a.shape
        rpad = -(-r // 8) * 8
        offs[name] = (cur, r, c)
        blk = jnp.zeros((rpad, LANE), jnp.float32).at[:r, :c].set(a)
        blocks.append(blk)
        cur += rpad
    return jnp.concatenate(blocks, axis=0), offs


def time_transformer_forward(x, params):
    """x: (B, T, E) float32 -> (x_episode_wise (B,), x_time_wise (B, T))."""
    B, T, E = x.shape
    C = params["wc"].shape[1]
    rows = B * T

    # ---- wrapper-side constant / weight packing (one slab -> one DMA) -------------
    scale2 = jnp.float32(1.0) / jnp.sqrt(jnp.float32(C))   # (C**-.25)**2 folded into Wq
    ridx = jnp.arange(rows)
    same = (ridx[:, None] // T) == (ridx[None, :] // T)
    causal = (ridx[:, None] % T) >= (ridx[None, :] % T)
    bias = jnp.where(same & causal, 0.0, -1e30).astype(jnp.float32)       # (rows, rows)
    seg = (jnp.arange(B)[:, None] == (ridx[None, :] // T)).astype(jnp.float32)  # (B, rows)

    entries = [
        ("pos", jnp.tile(params["pos"], (B, 1))),      # (rows, C)
        ("wc", params["wc"]),
        ("bc", params["bc"]),
        ("bias", bias),
        ("seg", seg),
        ("wr", params["wr"].T),                        # (1, C)
        ("br", params["br"]),                          # (1, 1)
    ]
    for d in range(DEPTH):
        for h in range(HEADS):
            entries += [
                (f"wq{d}_{h}", params["wq"][d][:, h * C:(h + 1) * C] * scale2),
                (f"wk{d}_{h}", params["wk"][d][:, h * C:(h + 1) * C]),
                (f"wv{d}_{h}", params["wv"][d][:, h * C:(h + 1) * C]),
                (f"wu{d}_{h}", params["wu"][d][h * C:(h + 1) * C, :]),
            ]
        entries += [
            (f"bu{d}", params["bu"][d]),
            (f"ln1g{d}", params["ln1g"][d]), (f"ln1b{d}", params["ln1b"][d]),
            (f"w1{d}", params["w1"][d]), (f"b1{d}", params["b1"][d]),
            (f"w2{d}", params["w2"][d]), (f"b2{d}", params["b2"][d]),
            (f"ln2g{d}", params["ln2g"][d]), (f"ln2b{d}", params["ln2b"][d]),
        ]

    slab, offs = _pack_slab(entries)
    x2d = x.reshape(rows, E).astype(jnp.float32)

    kernel = functools.partial(_time_transformer_kernel,
                               depth=DEPTH, heads=HEADS, offs=offs)

    out_t, out_e = pl.pallas_call(
        kernel,
        grid=(1,),   # single step: no wasted serial grid iterations on single-TC chips
        in_specs=[pl.BlockSpec((rows, E), lambda i: (0, 0)),
                  pl.BlockSpec(slab.shape, lambda i: (0, 0))],
        out_specs=(pl.BlockSpec((1, rows), lambda i: (0, 0)),
                   pl.BlockSpec((1, B), lambda i: (0, 0))),
        out_shape=(jax.ShapeDtypeStruct((1, rows), jnp.float32),
                   jax.ShapeDtypeStruct((1, B), jnp.float32)),
        compiler_params=pltpu.CompilerParams(dimension_semantics=("arbitrary",)),
    )(x2d, slab)

    x_time = out_t.reshape(B, T)        # rows are (batch, time) ordered
    x_episode = out_e.reshape(B)        # episode sum computed in the kernel epilogue
    return x_episode, x_time


def make_params(key):
    """Deterministic synthetic parameters matching the module's __init__ shapes."""
    ks = jax.random.split(key, 20)
    s = 0.1
    p = {
        "wc":  s * jax.random.normal(ks[0], (EMB, COMP_EMB), jnp.float32),
        "bc":  s * jax.random.normal(ks[1], (1, COMP_EMB), jnp.float32),
        "pos": s * jax.random.normal(ks[2], (SEQ_LEN, COMP_EMB), jnp.float32),
        # SelfAttentionWide per depth: Linear(C, H*C, bias=False) for q/k/v; unify Linear(H*C, C)
        "wq":  s * jax.random.normal(ks[3], (DEPTH, COMP_EMB, HEADS * COMP_EMB), jnp.float32),
        "wk":  s * jax.random.normal(ks[4], (DEPTH, COMP_EMB, HEADS * COMP_EMB), jnp.float32),
        "wv":  s * jax.random.normal(ks[5], (DEPTH, COMP_EMB, HEADS * COMP_EMB), jnp.float32),
        "wu":  s * jax.random.normal(ks[6], (DEPTH, HEADS * COMP_EMB, COMP_EMB), jnp.float32),
        "bu":  s * jax.random.normal(ks[7], (DEPTH, 1, COMP_EMB), jnp.float32),
        "ln1g": jnp.ones((DEPTH, 1, COMP_EMB), jnp.float32),
        "ln1b": jnp.zeros((DEPTH, 1, COMP_EMB), jnp.float32),
        "w1":  s * jax.random.normal(ks[8], (DEPTH, COMP_EMB, FF_HIDDEN), jnp.float32),
        "b1":  s * jax.random.normal(ks[9], (DEPTH, 1, FF_HIDDEN), jnp.float32),
        "w2":  s * jax.random.normal(ks[10], (DEPTH, FF_HIDDEN, COMP_EMB), jnp.float32),
        "b2":  s * jax.random.normal(ks[11], (DEPTH, 1, COMP_EMB), jnp.float32),
        "ln2g": jnp.ones((DEPTH, 1, COMP_EMB), jnp.float32),
        "ln2b": jnp.zeros((DEPTH, 1, COMP_EMB), jnp.float32),
        "wr":  s * jax.random.normal(ks[12], (COMP_EMB, 1), jnp.float32),
        "br":  s * jax.random.normal(ks[13], (1, 1), jnp.float32),
    }
    return p


def reference_forward(x, p):
    """Pure-JAX reference of the same forward pass (for correctness checking)."""
    B, T, E = x.shape
    C = p["wc"].shape[1]
    h = x @ p["wc"] + p["bc"] + p["pos"][None]
    scale = 1.0 / (C ** 0.25)
    causal = jnp.tril(jnp.ones((T, T), bool))
    for d in range(DEPTH):
        q = (h @ p["wq"][d]).reshape(B, T, HEADS, C)
        k = (h @ p["wk"][d]).reshape(B, T, HEADS, C)
        v = (h @ p["wv"][d]).reshape(B, T, HEADS, C)
        dot = jnp.einsum("bthc,bshc->bhts", q * scale, k * scale)
        dot = jnp.where(causal[None, None], dot, -jnp.inf)
        dot = jax.nn.softmax(dot, axis=-1)
        o = jnp.einsum("bhts,bshc->bthc", dot, v).reshape(B, T, HEADS * C)
        attn = o @ p["wu"][d] + p["bu"][d]
        h = _layernorm(attn + h, p["ln1g"][d], p["ln1b"][d])
        ff = jnp.maximum(h @ p["w1"][d] + p["b1"][d], 0.0) @ p["w2"][d] + p["b2"][d]
        h = _layernorm(ff + h, p["ln2g"][d], p["ln2b"][d])
    r = (h @ p["wr"] + p["br"])[..., 0]
    return r.sum(axis=1), r


if __name__ == "__main__":
    key = jax.random.PRNGKey(0)
    kx, kp = jax.random.split(key)
    x = jax.random.normal(kx, (BATCH, SEQ_LEN, EMB), jnp.float32)
    params = make_params(kp)

    ep, tw = time_transformer_forward(x, params)
    jax.block_until_ready((ep, tw))

    ep_ref, tw_ref = reference_forward(x, params)
    # Tolerance accounts for the EUP approximate reciprocal used in the softmax.
    assert jnp.allclose(tw, tw_ref, rtol=5e-3, atol=5e-3), "time-wise mismatch"
    assert jnp.allclose(ep, ep_ref, rtol=5e-3, atol=5e-3), "episode-wise mismatch"

    print("KERNEL_OK")
</pallas_src>

<mosaic_0001>
module attributes {stable_mosaic.version = 11 : i64} {
  func.func @_time_transformer_kernel(%arg0: i32, %arg1: memref<16x32xf32, #tpu.memory_space<vmem>>, %arg2: memref<624x128xf32, #tpu.memory_space<vmem>>, %arg3: memref<1x16xf32, #tpu.memory_space<vmem>>, %arg4: memref<1x2xf32, #tpu.memory_space<vmem>>) attributes {dimension_semantics = [#tpu.dimension_semantics<arbitrary>], iteration_bounds = array<i64: 1>, scalar_prefetch = 0 : i64, scratch_operands = 0 : i64, tpu.core_type = #tpu.core_type<tc>, window_params = [{pipeline_mode = #tpu.pipeline_mode<synchronous>, transform_indices = @transform_0, window_bounds = array<i64: 16, 32>}, {pipeline_mode = #tpu.pipeline_mode<synchronous>, transform_indices = @transform_1, window_bounds = array<i64: 624, 128>}, {pipeline_mode = #tpu.pipeline_mode<synchronous>, transform_indices = @transform_2, window_bounds = array<i64: 1, 16>}, {pipeline_mode = #tpu.pipeline_mode<synchronous>, transform_indices = @transform_3, window_bounds = array<i64: 1, 2>}]} {
    %c0 = arith.constant 0 : index
    %c0_0 = arith.constant 0 : index
    %0 = vector.load %arg1[%c0, %c0_0] : memref<16x32xf32, #tpu.memory_space<vmem>>, vector<16x32xf32>
    %c16 = arith.constant 16 : index
    %c0_1 = arith.constant 0 : index
    %1 = vector.load %arg2[%c16, %c0_1] : memref<624x128xf32, #tpu.memory_space<vmem>>, vector<32x16xf32>
    %cst = arith.constant dense<0.000000e+00> : vector<16x16xf32>
    %2 = tpu.matmul %0, %1, %cst {dimension_numbers = #tpu.dot_dimension_numbers<[1], [0], [0], [1], [0, 0, 1, 1], [], []>} : vector<16x32xf32>, vector<32x16xf32>, vector<16x16xf32> -> vector<16x16xf32>
    %c48 = arith.constant 48 : index
    %c0_2 = arith.constant 0 : index
    %3 = vector.load %arg2[%c48, %c0_2] : memref<624x128xf32, #tpu.memory_space<vmem>>, vector<1x16xf32>
    %4 = vector.broadcast %3 : vector<1x16xf32> to vector<16x16xf32>
    %5 = arith.addf %2, %4 : vector<16x16xf32>
    %c0_3 = arith.constant 0 : index
    %c0_4 = arith.constant 0 : index
    %6 = vector.load %arg2[%c0_3, %c0_4] : memref<624x128xf32, #tpu.memory_space<vmem>>, vector<16x16xf32>
    %7 = arith.addf %5, %6 : vector<16x16xf32>
    %c56 = arith.constant 56 : index
    %c0_5 = arith.constant 0 : index
    %8 = vector.load %arg2[%c56, %c0_5] : memref<624x128xf32, #tpu.memory_space<vmem>>, vector<16x16xf32>
    %c224 = arith.constant 224 : index
    %c0_6 = arith.constant 0 : index
    %9 = vector.load %arg2[%c224, %c0_6] : memref<624x128xf32, #tpu.memory_space<vmem>>, vector<1x16xf32>
    %c96 = arith.constant 96 : index
    %c0_7 = arith.constant 0 : index
    %10 = vector.load %arg2[%c96, %c0_7] : memref<624x128xf32, #tpu.memory_space<vmem>>, vector<16x16xf32>
    %cst_8 = arith.constant dense<0.000000e+00> : vector<16x16xf32>
    %11 = tpu.matmul %7, %10, %cst_8 {dimension_numbers = #tpu.dot_dimension_numbers<[1], [0], [0], [1], [0, 0, 1, 1], [], []>} : vector<16x16xf32>, vector<16x16xf32>, vector<16x16xf32> -> vector<16x16xf32>
    %c112 = arith.constant 112 : index
    %c0_9 = arith.constant 0 : index
    %12 = vector.load %arg2[%c112, %c0_9] : memref<624x128xf32, #tpu.memory_space<vmem>>, vector<16x16xf32>
    %cst_10 = arith.constant dense<0.000000e+00> : vector<16x16xf32>
    %13 = tpu.matmul %7, %12, %cst_10 {dimension_numbers = #tpu.dot_dimension_numbers<[1], [0], [0], [1], [0, 0, 1, 1], [], []>} : vector<16x16xf32>, vector<16x16xf32>, vector<16x16xf32> -> vector<16x16xf32>
    %c128 = arith.constant 128 : index
    %c0_11 = arith.constant 0 : index
    %14 = vector.load %arg2[%c128, %c0_11] : memref<624x128xf32, #tpu.memory_space<vmem>>, vector<16x16xf32>
    %cst_12 = arith.constant dense<0.000000e+00> : vector<16x16xf32>
    %15 = tpu.matmul %7, %14, %cst_12 {dimension_numbers = #tpu.dot_dimension_numbers<[1], [0], [0], [1], [0, 0, 1, 1], [], []>} : vector<16x16xf32>, vector<16x16xf32>, vector<16x16xf32> -> vector<16x16xf32>
    "tpu.trace_start"() <{level = 10 : i32, message = "rc,sc->rs"}> : () -> ()
    %cst_13 = arith.constant dense<0.000000e+00> : vector<16x16xf32>
    %16 = tpu.matmul %11, %13, %cst_13 {dimension_numbers = #tpu.dot_dimension_numbers<[1], [1], [0], [0], [0, 0, 1, 0], [], []>} : vector<16x16xf32>, vector<16x16xf32>, vector<16x16xf32> -> vector<16x16xf32>
    "tpu.trace_stop"() : () -> ()
    %17 = arith.addf %16, %8 : vector<16x16xf32>
    %cst_14 = arith.constant dense<0xFF800000> : vector<16xf32>
    %18 = vector.multi_reduction <maximumf>, %17, %cst_14 [1] : vector<16x16xf32> to vector<16xf32>
    %19 = vector.shape_cast %18 : vector<16xf32> to vector<16x1xf32>
    %20 = vector.broadcast %19 : vector<16x1xf32> to vector<16x16xf32>
    %21 = arith.subf %17, %20 : vector<16x16xf32>
    %22 = math.exp %21 : vector<16x16xf32>
    %cst_15 = arith.constant dense<0.000000e+00> : vector<16xf32>
    %23 = vector.multi_reduction <add>, %22, %cst_15 [1] : vector<16x16xf32> to vector<16xf32>
    %24 = vector.shape_cast %23 : vector<16xf32> to vector<16x1xf32>
    %25 = tpu.reciprocal %24 {approx = true} : vector<16x1xf32> -> vector<16x1xf32>
    %26 = vector.broadcast %25 : vector<16x1xf32> to vector<16x16xf32>
    %27 = arith.mulf %22, %26 : vector<16x16xf32>
    %cst_16 = arith.constant dense<0.000000e+00> : vector<16x16xf32>
    %28 = tpu.matmul %27, %15, %cst_16 {dimension_numbers = #tpu.dot_dimension_numbers<[1], [0], [0], [1], [0, 0, 1, 1], [], []>} : vector<16x16xf32>, vector<16x16xf32>, vector<16x16xf32> -> vector<16x16xf32>
    %c144 = arith.constant 144 : index
    %c0_17 = arith.constant 0 : index
    %29 = vector.load %arg2[%c144, %c0_17] : memref<624x128xf32, #tpu.memory_space<vmem>>, vector<16x16xf32>
    %cst_18 = arith.constant dense<0.000000e+00> : vector<16x16xf32>
    %30 = tpu.matmul %28, %29, %cst_18 {dimension_numbers = #tpu.dot_dimension_numbers<[1], [0], [0], [1], [0, 0, 1, 1], [], []>} : vector<16x16xf32>, vector<16x16xf32>, vector<16x16xf32> -> vector<16x16xf32>
    %31 = vector.broadcast %9 : vector<1x16xf32> to vector<16x16xf32>
    %32 = arith.addf %31, %30 : vector<16x16xf32>
    %c160 = arith.constant 160 : index
    %c0_19 = arith.constant 0 : index
    %33 = vector.load %arg2[%c160, %c0_19] : memref<624x128xf32, #tpu.memory_space<vmem>>, vector<16x16xf32>
    %cst_20 = arith.constant dense<0.000000e+00> : vector<16x16xf32>
    %34 = tpu.matmul %7, %33, %cst_20 {dimension_numbers = #tpu.dot_dimension_numbers<[1], [0], [0], [1], [0, 0, 1, 1], [], []>} : vector<16x16xf32>, vector<16x16xf32>, vector<16x16xf32> -> vector<16x16xf32>
    %c176 = arith.constant 176 : index
    %c0_21 = arith.constant 0 : index
    %35 = vector.load %arg2[%c176, %c0_21] : memref<624x128xf32, #tpu.memory_space<vmem>>, vector<16x16xf32>
    %cst_22 = arith.constant dense<0.000000e+00> : vector<16x16xf32>
    %36 = tpu.matmul %7, %35, %cst_22 {dimension_numbers = #tpu.dot_dimension_numbers<[1], [0], [0], [1], [0, 0, 1, 1], [], []>} : vector<16x16xf32>, vector<16x16xf32>, vector<16x16xf32> -> vector<16x16xf32>
    %c192 = arith.constant 192 : index
    %c0_23 = arith.constant 0 : index
    %37 = vector.load %arg2[%c192, %c0_23] : memref<624x128xf32, #tpu.memory_space<vmem>>, vector<16x16xf32>
    %cst_24 = arith.constant dense<0.000000e+00> : vector<16x16xf32>
    %38 = tpu.matmul %7, %37, %cst_24 {dimension_numbers = #tpu.dot_dimension_numbers<[1], [0], [0], [1], [0, 0, 1, 1], [], []>} : vector<16x16xf32>, vector<16x16xf32>, vector<16x16xf32> -> vector<16x16xf32>
    "tpu.trace_start"() <{level = 10 : i32, message = "rc,sc->rs"}> : () -> ()
    %cst_25 = arith.constant dense<0.000000e+00> : vector<16x16xf32>
    %39 = tpu.matmul %34, %36, %cst_25 {dimension_numbers = #tpu.dot_dimension_numbers<[1], [1], [0], [0], [0, 0, 1, 0], [], []>} : vector<16x16xf32>, vector<16x16xf32>, vector<16x16xf32> -> vector<16x16xf32>
    "tpu.trace_stop"() : () -> ()
    %40 = arith.addf %39, %8 : vector<16x16xf32>
    %cst_26 = arith.constant dense<0xFF800000> : vector<16xf32>
    %41 = vector.multi_reduction <maximumf>, %40, %cst_26 [1] : vector<16x16xf32> to vector<16xf32>
    %42 = vector.shape_cast %41 : vector<16xf32> to vector<16x1xf32>
    %43 = vector.broadcast %42 : vector<16x1xf32> to vector<16x16xf32>
    %44 = arith.subf %40, %43 : vector<16x16xf32>
    %45 = math.exp %44 : vector<16x16xf32>
    %cst_27 = arith.constant dense<0.000000e+00> : vector<16xf32>
    %46 = vector.multi_reduction <add>, %45, %cst_27 [1] : vector<16x16xf32> to vector<16xf32>
    %47 = vector.shape_cast %46 : vector<16xf32> to vector<16x1xf32>
    %48 = tpu.reciprocal %47 {approx = true} : vector<16x1xf32> -> vector<16x1xf32>
    %49 = vector.broadcast %48 : vector<16x1xf32> to vector<16x16xf32>
    %50 = arith.mulf %45, %49 : vector<16x16xf32>
    %cst_28 = arith.constant dense<0.000000e+00> : vector<16x16xf32>
    %51 = tpu.matmul %50, %38, %cst_28 {dimension_numbers = #tpu.dot_dimension_numbers<[1], [0], [0], [1], [0, 0, 1, 1], [], []>} : vector<16x16xf32>, vector<16x16xf32>, vector<16x16xf32> -> vector<16x16xf32>
    %c208 = arith.constant 208 : index
    %c0_29 = arith.constant 0 : index
    %52 = vector.load %arg2[%c208, %c0_29] : memref<624x128xf32, #tpu.memory_space<vmem>>, vector<16x16xf32>
    %cst_30 = arith.constant dense<0.000000e+00> : vector<16x16xf32>
    %53 = tpu.matmul %51, %52, %cst_30 {dimension_numbers = #tpu.dot_dimension_numbers<[1], [0], [0], [1], [0, 0, 1, 1], [], []>} : vector<16x16xf32>, vector<16x16xf32>, vector<16x16xf32> -> vector<16x16xf32>
    %54 = arith.addf %32, %53 : vector<16x16xf32>
    %55 = arith.addf %54, %7 : vector<16x16xf32>
    %c232 = arith.constant 232 : index
    %c0_31 = arith.constant 0 : index
    %56 = vector.load %arg2[%c232, %c0_31] : memref<624x128xf32, #tpu.memory_space<vmem>>, vector<1x16xf32>
    %c240 = arith.constant 240 : index
    %c0_32 = arith.constant 0 : index
    %57 = vector.load %arg2[%c240, %c0_32] : memref<624x128xf32, #tpu.memory_space<vmem>>, vector<1x16xf32>
    %cst_33 = arith.constant dense<0.000000e+00> : vector<16xf32>
    %58 = vector.multi_reduction <add>, %55, %cst_33 [1] : vector<16x16xf32> to vector<16xf32>
    %59 = vector.shape_cast %58 : vector<16xf32> to vector<16x1xf32>
    %cst_34 = arith.constant 1.600000e+01 : f32
    %60 = vector.broadcast %cst_34 : f32 to vector<16x1xf32>
    %61 = arith.divf %59, %60 : vector<16x1xf32>
    %62 = vector.broadcast %61 : vector<16x1xf32> to vector<16x16xf32>
    %63 = arith.subf %55, %62 : vector<16x16xf32>
    %64 = arith.mulf %63, %63 : vector<16x16xf32>
    %cst_35 = arith.constant dense<0.000000e+00> : vector<16xf32>
    %65 = vector.multi_reduction <add>, %64, %cst_35 [1] : vector<16x16xf32> to vector<16xf32>
    %66 = vector.shape_cast %65 : vector<16xf32> to vector<16x1xf32>
    %cst_36 = arith.constant 1.600000e+01 : f32
    %67 = vector.broadcast %cst_36 : f32 to vector<16x1xf32>
    %68 = arith.divf %66, %67 : vector<16x1xf32>
    %69 = vector.broadcast %61 : vector<16x1xf32> to vector<16x16xf32>
    %70 = arith.subf %55, %69 : vector<16x16xf32>
    %cst_37 = arith.constant 9.99999974E-6 : f32
    %71 = vector.broadcast %cst_37 : f32 to vector<16x1xf32>
    %72 = arith.addf %68, %71 : vector<16x1xf32>
    %73 = math.rsqrt %72 : vector<16x1xf32>
    %74 = vector.broadcast %73 : vector<16x1xf32> to vector<16x16xf32>
    %75 = arith.mulf %70, %74 : vector<16x16xf32>
    %76 = vector.broadcast %56 : vector<1x16xf32> to vector<16x16xf32>
    %77 = arith.mulf %75, %76 : vector<16x16xf32>
    %78 = vector.broadcast %57 : vector<1x16xf32> to vector<16x16xf32>
    %79 = arith.addf %77, %78 : vector<16x16xf32>
    %c248 = arith.constant 248 : index
    %c0_38 = arith.constant 0 : index
    %80 = vector.load %arg2[%c248, %c0_38] : memref<624x128xf32, #tpu.memory_space<vmem>>, vector<16x64xf32>
    %cst_39 = arith.constant dense<0.000000e+00> : vector<16x64xf32>
    %81 = tpu.matmul %79, %80, %cst_39 {dimension_numbers = #tpu.dot_dimension_numbers<[1], [0], [0], [1], [0, 0, 1, 1], [], []>} : vector<16x16xf32>, vector<16x64xf32>, vector<16x64xf32> -> vector<16x64xf32>
    %c264 = arith.constant 264 : index
    %c0_40 = arith.constant 0 : index
    %82 = vector.load %arg2[%c264, %c0_40] : memref<624x128xf32, #tpu.memory_space<vmem>>, vector<1x64xf32>
    %83 = vector.broadcast %82 : vector<1x64xf32> to vector<16x64xf32>
    %84 = arith.addf %81, %83 : vector<16x64xf32>
    %cst_41 = arith.constant 0.000000e+00 : f32
    %85 = vector.broadcast %cst_41 : f32 to vector<16x64xf32>
    %86 = arith.maximumf %84, %85 : vector<16x64xf32>
    %c272 = arith.constant 272 : index
    %c0_42 = arith.constant 0 : index
    %87 = vector.load %arg2[%c272, %c0_42] : memref<624x128xf32, #tpu.memory_space<vmem>>, vector<64x16xf32>
    %cst_43 = arith.constant dense<0.000000e+00> : vector<16x16xf32>
    %88 = tpu.matmul %86, %87, %cst_43 {dimension_numbers = #tpu.dot_dimension_numbers<[1], [0], [0], [1], [0, 0, 1, 1], [], []>} : vector<16x64xf32>, vector<64x16xf32>, vector<16x16xf32> -> vector<16x16xf32>
    %c336 = arith.constant 336 : index
    %c0_44 = arith.constant 0 : index
    %89 = vector.load %arg2[%c336, %c0_44] : memref<624x128xf32, #tpu.memory_space<vmem>>, vector<1x16xf32>
    %90 = vector.broadcast %89 : vector<1x16xf32> to vector<16x16xf32>
    %91 = arith.addf %88, %90 : vector<16x16xf32>
    %92 = arith.addf %91, %79 : vector<16x16xf32>
    %c344 = arith.constant 344 : index
    %c0_45 = arith.constant 0 : index
    %93 = vector.load %arg2[%c344, %c0_45] : memref<624x128xf32, #tpu.memory_space<vmem>>, vector<1x16xf32>
    %c352 = arith.constant 352 : index
    %c0_46 = arith.constant 0 : index
    %94 = vector.load %arg2[%c352, %c0_46] : memref<624x128xf32, #tpu.memory_space<vmem>>, vector<1x16xf32>
    %cst_47 = arith.constant dense<0.000000e+00> : vector<16xf32>
    %95 = vector.multi_reduction <add>, %92, %cst_47 [1] : vector<16x16xf32> to vector<16xf32>
    %96 = vector.shape_cast %95 : vector<16xf32> to vector<16x1xf32>
    %cst_48 = arith.constant 1.600000e+01 : f32
    %97 = vector.broadcast %cst_48 : f32 to vector<16x1xf32>
    %98 = arith.divf %96, %97 : vector<16x1xf32>
    %99 = vector.broadcast %98 : vector<16x1xf32> to vector<16x16xf32>
    %100 = arith.subf %92, %99 : vector<16x16xf32>
    %101 = arith.mulf %100, %100 : vector<16x16xf32>
    %cst_49 = arith.constant dense<0.000000e+00> : vector<16xf32>
    %102 = vector.multi_reduction <add>, %101, %cst_49 [1] : vector<16x16xf32> to vector<16xf32>
    %103 = vector.shape_cast %102 : vector<16xf32> to vector<16x1xf32>
    %cst_50 = arith.constant 1.600000e+01 : f32
    %104 = vector.broadcast %cst_50 : f32 to vector<16x1xf32>
    %105 = arith.divf %103, %104 : vector<16x1xf32>
    %106 = vector.broadcast %98 : vector<16x1xf32> to vector<16x16xf32>
    %107 = arith.subf %92, %106 : vector<16x16xf32>
    %cst_51 = arith.constant 9.99999974E-6 : f32
    %108 = vector.broadcast %cst_51 : f32 to vector<16x1xf32>
    %109 = arith.addf %105, %108 : vector<16x1xf32>
    %110 = math.rsqrt %109 : vector<16x1xf32>
    %111 = vector.broadcast %110 : vector<16x1xf32> to vector<16x16xf32>
    %112 = arith.mulf %107, %111 : vector<16x16xf32>
    %113 = vector.broadcast %93 : vector<1x16xf32> to vector<16x16xf32>
    %114 = arith.mulf %112, %113 : vector<16x16xf32>
    %115 = vector.broadcast %94 : vector<1x16xf32> to vector<16x16xf32>
    %116 = arith.addf %114, %115 : vector<16x16xf32>
    %c488 = arith.constant 488 : index
    %c0_52 = arith.constant 0 : index
    %117 = vector.load %arg2[%c488, %c0_52] : memref<624x128xf32, #tpu.memory_space<vmem>>, vector<1x16xf32>
    %c360 = arith.constant 360 : index
    %c0_53 = arith.constant 0 : index
    %118 = vector.load %arg2[%c360, %c0_53] : memref<624x128xf32, #tpu.memory_space<vmem>>, vector<16x16xf32>
    %cst_54 = arith.constant dense<0.000000e+00> : vector<16x16xf32>
    %119 = tpu.matmul %116, %118, %cst_54 {dimension_numbers = #tpu.dot_dimension_numbers<[1], [0], [0], [1], [0, 0, 1, 1], [], []>} : vector<16x16xf32>, vector<16x16xf32>, vector<16x16xf32> -> vector<16x16xf32>
    %c376 = arith.constant 376 : index
    %c0_55 = arith.constant 0 : index
    %120 = vector.load %arg2[%c376, %c0_55] : memref<624x128xf32, #tpu.memory_space<vmem>>, vector<16x16xf32>
    %cst_56 = arith.constant dense<0.000000e+00> : vector<16x16xf32>
    %121 = tpu.matmul %116, %120, %cst_56 {dimension_numbers = #tpu.dot_dimension_numbers<[1], [0], [0], [1], [0, 0, 1, 1], [], []>} : vector<16x16xf32>, vector<16x16xf32>, vector<16x16xf32> -> vector<16x16xf32>
    %c392 = arith.constant 392 : index
    %c0_57 = arith.constant 0 : index
    %122 = vector.load %arg2[%c392, %c0_57] : memref<624x128xf32, #tpu.memory_space<vmem>>, vector<16x16xf32>
    %cst_58 = arith.constant dense<0.000000e+00> : vector<16x16xf32>
    %123 = tpu.matmul %116, %122, %cst_58 {dimension_numbers = #tpu.dot_dimension_numbers<[1], [0], [0], [1], [0, 0, 1, 1], [], []>} : vector<16x16xf32>, vector<16x16xf32>, vector<16x16xf32> -> vector<16x16xf32>
    "tpu.trace_start"() <{level = 10 : i32, message = "rc,sc->rs"}> : () -> ()
    %cst_59 = arith.constant dense<0.000000e+00> : vector<16x16xf32>
    %124 = tpu.matmul %119, %121, %cst_59 {dimension_numbers = #tpu.dot_dimension_numbers<[1], [1], [0], [0], [0, 0, 1, 0], [], []>} : vector<16x16xf32>, vector<16x16xf32>, vector<16x16xf32> -> vector<16x16xf32>
    "tpu.trace_stop"() : () -> ()
    %125 = arith.addf %124, %8 : vector<16x16xf32>
    %cst_60 = arith.constant dense<0xFF800000> : vector<16xf32>
    %126 = vector.multi_reduction <maximumf>, %125, %cst_60 [1] : vector<16x16xf32> to vector<16xf32>
    %127 = vector.shape_cast %126 : vector<16xf32> to vector<16x1xf32>
    %128 = vector.broadcast %127 : vector<16x1xf32> to vector<16x16xf32>
    %129 = arith.subf %125, %128 : vector<16x16xf32>
    %130 = math.exp %129 : vector<16x16xf32>
    %cst_61 = arith.constant dense<0.000000e+00> : vector<16xf32>
    %131 = vector.multi_reduction <add>, %130, %cst_61 [1] : vector<16x16xf32> to vector<16xf32>
    %132 = vector.shape_cast %131 : vector<16xf32> to vector<16x1xf32>
    %133 = tpu.reciprocal %132 {approx = true} : vector<16x1xf32> -> vector<16x1xf32>
    %134 = vector.broadcast %133 : vector<16x1xf32> to vector<16x16xf32>
    %135 = arith.mulf %130, %134 : vector<16x16xf32>
    %cst_62 = arith.constant dense<0.000000e+00> : vector<16x16xf32>
    %136 = tpu.matmul %135, %123, %cst_62 {dimension_numbers = #tpu.dot_dimension_numbers<[1], [0], [0], [1], [0, 0, 1, 1], [], []>} : vector<16x16xf32>, vector<16x16xf32>, vector<16x16xf32> -> vector<16x16xf32>
    %c408 = arith.constant 408 : index
    %c0_63 = arith.constant 0 : index
    %137 = vector.load %arg2[%c408, %c0_63] : memref<624x128xf32, #tpu.memory_space<vmem>>, vector<16x16xf32>
    %cst_64 = arith.constant dense<0.000000e+00> : vector<16x16xf32>
    %138 = tpu.matmul %136, %137, %cst_64 {dimension_numbers = #tpu.dot_dimension_numbers<[1], [0], [0], [1], [0, 0, 1, 1], [], []>} : vector<16x16xf32>, vector<16x16xf32>, vector<16x16xf32> -> vector<16x16xf32>
    %139 = vector.broadcast %117 : vector<1x16xf32> to vector<16x16xf32>
    %140 = arith.addf %139, %138 : vector<16x16xf32>
    %c424 = arith.constant 424 : index
    %c0_65 = arith.constant 0 : index
    %141 = vector.load %arg2[%c424, %c0_65] : memref<624x128xf32, #tpu.memory_space<vmem>>, vector<16x16xf32>
    %cst_66 = arith.constant dense<0.000000e+00> : vector<16x16xf32>
    %142 = tpu.matmul %116, %141, %cst_66 {dimension_numbers = #tpu.dot_dimension_numbers<[1], [0], [0], [1], [0, 0, 1, 1], [], []>} : vector<16x16xf32>, vector<16x16xf32>, vector<16x16xf32> -> vector<16x16xf32>
    %c440 = arith.constant 440 : index
    %c0_67 = arith.constant 0 : index
    %143 = vector.load %arg2[%c440, %c0_67] : memref<624x128xf32, #tpu.memory_space<vmem>>, vector<16x16xf32>
    %cst_68 = arith.constant dense<0.000000e+00> : vector<16x16xf32>
    %144 = tpu.matmul %116, %143, %cst_68 {dimension_numbers = #tpu.dot_dimension_numbers<[1], [0], [0], [1], [0, 0, 1, 1], [], []>} : vector<16x16xf32>, vector<16x16xf32>, vector<16x16xf32> -> vector<16x16xf32>
    %c456 = arith.constant 456 : index
    %c0_69 = arith.constant 0 : index
    %145 = vector.load %arg2[%c456, %c0_69] : memref<624x128xf32, #tpu.memory_space<vmem>>, vector<16x16xf32>
    %cst_70 = arith.constant dense<0.000000e+00> : vector<16x16xf32>
    %146 = tpu.matmul %116, %145, %cst_70 {dimension_numbers = #tpu.dot_dimension_numbers<[1], [0], [0], [1], [0, 0, 1, 1], [], []>} : vector<16x16xf32>, vector<16x16xf32>, vector<16x16xf32> -> vector<16x16xf32>
    "tpu.trace_start"() <{level = 10 : i32, message = "rc,sc->rs"}> : () -> ()
    %cst_71 = arith.constant dense<0.000000e+00> : vector<16x16xf32>
    %147 = tpu.matmul %142, %144, %cst_71 {dimension_numbers = #tpu.dot_dimension_numbers<[1], [1], [0], [0], [0, 0, 1, 0], [], []>} : vector<16x16xf32>, vector<16x16xf32>, vector<16x16xf32> -> vector<16x16xf32>
    "tpu.trace_stop"() : () -> ()
    %148 = arith.addf %147, %8 : vector<16x16xf32>
    %cst_72 = arith.constant dense<0xFF800000> : vector<16xf32>
    %149 = vector.multi_reduction <maximumf>, %148, %cst_72 [1] : vector<16x16xf32> to vector<16xf32>
    %150 = vector.shape_cast %149 : vector<16xf32> to vector<16x1xf32>
    %151 = vector.broadcast %150 : vector<16x1xf32> to vector<16x16xf32>
    %152 = arith.subf %148, %151 : vector<16x16xf32>
    %153 = math.exp %152 : vector<16x16xf32>
    %cst_73 = arith.constant dense<0.000000e+00> : vector<16xf32>
    %154 = vector.multi_reduction <add>, %153, %cst_73 [1] : vector<16x16xf32> to vector<16xf32>
    %155 = vector.shape_cast %154 : vector<16xf32> to vector<16x1xf32>
    %156 = tpu.reciprocal %155 {approx = true} : vector<16x1xf32> -> vector<16x1xf32>
    %157 = vector.broadcast %156 : vector<16x1xf32> to vector<16x16xf32>
    %158 = arith.mulf %153, %157 : vector<16x16xf32>
    %cst_74 = arith.constant dense<0.000000e+00> : vector<16x16xf32>
    %159 = tpu.matmul %158, %146, %cst_74 {dimension_numbers = #tpu.dot_dimension_numbers<[1], [0], [0], [1], [0, 0, 1, 1], [], []>} : vector<16x16xf32>, vector<16x16xf32>, vector<16x16xf32> -> vector<16x16xf32>
    %c472 = arith.constant 472 : index
    %c0_75 = arith.constant 0 : index
    %160 = vector.load %arg2[%c472, %c0_75] : memref<624x128xf32, #tpu.memory_space<vmem>>, vector<16x16xf32>
    %cst_76 = arith.constant dense<0.000000e+00> : vector<16x16xf32>
    %161 = tpu.matmul %159, %160, %cst_76 {dimension_numbers = #tpu.dot_dimension_numbers<[1], [0], [0], [1], [0, 0, 1, 1], [], []>} : vector<16x16xf32>, vector<16x16xf32>, vector<16x16xf32> -> vector<16x16xf32>
    %162 = arith.addf %140, %161 : vector<16x16xf32>
    %163 = arith.addf %162, %116 : vector<16x16xf32>
    %c496 = arith.constant 496 : index
    %c0_77 = arith.constant 0 : index
    %164 = vector.load %arg2[%c496, %c0_77] : memref<624x128xf32, #tpu.memory_space<vmem>>, vector<1x16xf32>
    %c504 = arith.constant 504 : index
    %c0_78 = arith.constant 0 : index
    %165 = vector.load %arg2[%c504, %c0_78] : memref<624x128xf32, #tpu.memory_space<vmem>>, vector<1x16xf32>
    %cst_79 = arith.constant dense<0.000000e+00> : vector<16xf32>
    %166 = vector.multi_reduction <add>, %163, %cst_79 [1] : vector<16x16xf32> to vector<16xf32>
    %167 = vector.shape_cast %166 : vector<16xf32> to vector<16x1xf32>
    %cst_80 = arith.constant 1.600000e+01 : f32
    %168 = vector.broadcast %cst_80 : f32 to vector<16x1xf32>
    %169 = arith.divf %167, %168 : vector<16x1xf32>
    %170 = vector.broadcast %169 : vector<16x1xf32> to vector<16x16xf32>
    %171 = arith.subf %163, %170 : vector<16x16xf32>
    %172 = arith.mulf %171, %171 : vector<16x16xf32>
    %cst_81 = arith.constant dense<0.000000e+00> : vector<16xf32>
    %173 = vector.multi_reduction <add>, %172, %cst_81 [1] : vector<16x16xf32> to vector<16xf32>
    %174 = vector.shape_cast %173 : vector<16xf32> to vector<16x1xf32>
    %cst_82 = arith.constant 1.600000e+01 : f32
    %175 = vector.broadcast %cst_82 : f32 to vector<16x1xf32>
    %176 = arith.divf %174, %175 : vector<16x1xf32>
    %177 = vector.broadcast %169 : vector<16x1xf32> to vector<16x16xf32>
    %178 = arith.subf %163, %177 : vector<16x16xf32>
    %cst_83 = arith.constant 9.99999974E-6 : f32
    %179 = vector.broadcast %cst_83 : f32 to vector<16x1xf32>
    %180 = arith.addf %176, %179 : vector<16x1xf32>
    %181 = math.rsqrt %180 : vector<16x1xf32>
    %182 = vector.broadcast %181 : vector<16x1xf32> to vector<16x16xf32>
    %183 = arith.mulf %178, %182 : vector<16x16xf32>
    %184 = vector.broadcast %164 : vector<1x16xf32> to vector<16x16xf32>
    %185 = arith.mulf %183, %184 : vector<16x16xf32>
    %186 = vector.broadcast %165 : vector<1x16xf32> to vector<16x16xf32>
    %187 = arith.addf %185, %186 : vector<16x16xf32>
    %c512 = arith.constant 512 : index
    %c0_84 = arith.constant 0 : index
    %188 = vector.load %arg2[%c512, %c0_84] : memref<624x128xf32, #tpu.memory_space<vmem>>, vector<16x64xf32>
    %cst_85 = arith.constant dense<0.000000e+00> : vector<16x64xf32>
    %189 = tpu.matmul %187, %188, %cst_85 {dimension_numbers = #tpu.dot_dimension_numbers<[1], [0], [0], [1], [0, 0, 1, 1], [], []>} : vector<16x16xf32>, vector<16x64xf32>, vector<16x64xf32> -> vector<16x64xf32>
    %c528 = arith.constant 528 : index
    %c0_86 = arith.constant 0 : index
    %190 = vector.load %arg2[%c528, %c0_86] : memref<624x128xf32, #tpu.memory_space<vmem>>, vector<1x64xf32>
    %191 = vector.broadcast %190 : vector<1x64xf32> to vector<16x64xf32>
    %192 = arith.addf %189, %191 : vector<16x64xf32>
    %cst_87 = arith.constant 0.000000e+00 : f32
    %193 = vector.broadcast %cst_87 : f32 to vector<16x64xf32>
    %194 = arith.maximumf %192, %193 : vector<16x64xf32>
    %c536 = arith.constant 536 : index
    %c0_88 = arith.constant 0 : index
    %195 = vector.load %arg2[%c536, %c0_88] : memref<624x128xf32, #tpu.memory_space<vmem>>, vector<64x16xf32>
    %cst_89 = arith.constant dense<0.000000e+00> : vector<16x16xf32>
    %196 = tpu.matmul %194, %195, %cst_89 {dimension_numbers = #tpu.dot_dimension_numbers<[1], [0], [0], [1], [0, 0, 1, 1], [], []>} : vector<16x64xf32>, vector<64x16xf32>, vector<16x16xf32> -> vector<16x16xf32>
    %c600 = arith.constant 600 : index
    %c0_90 = arith.constant 0 : index
    %197 = vector.load %arg2[%c600, %c0_90] : memref<624x128xf32, #tpu.memory_space<vmem>>, vector<1x16xf32>
    %198 = vector.broadcast %197 : vector<1x16xf32> to vector<16x16xf32>
    %199 = arith.addf %196, %198 : vector<16x16xf32>
    %200 = arith.addf %199, %187 : vector<16x16xf32>
    %c608 = arith.constant 608 : index
    %c0_91 = arith.constant 0 : index
    %201 = vector.load %arg2[%c608, %c0_91] : memref<624x128xf32, #tpu.memory_space<vmem>>, vector<1x16xf32>
    %c616 = arith.constant 616 : index
    %c0_92 = arith.constant 0 : index
    %202 = vector.load %arg2[%c616, %c0_92] : memref<624x128xf32, #tpu.memory_space<vmem>>, vector<1x16xf32>
    %cst_93 = arith.constant dense<0.000000e+00> : vector<16xf32>
    %203 = vector.multi_reduction <add>, %200, %cst_93 [1] : vector<16x16xf32> to vector<16xf32>
    %204 = vector.shape_cast %203 : vector<16xf32> to vector<16x1xf32>
    %cst_94 = arith.constant 1.600000e+01 : f32
    %205 = vector.broadcast %cst_94 : f32 to vector<16x1xf32>
    %206 = arith.divf %204, %205 : vector<16x1xf32>
    %207 = vector.broadcast %206 : vector<16x1xf32> to vector<16x16xf32>
    %208 = arith.subf %200, %207 : vector<16x16xf32>
    %209 = arith.mulf %208, %208 : vector<16x16xf32>
    %cst_95 = arith.constant dense<0.000000e+00> : vector<16xf32>
    %210 = vector.multi_reduction <add>, %209, %cst_95 [1] : vector<16x16xf32> to vector<16xf32>
    %211 = vector.shape_cast %210 : vector<16xf32> to vector<16x1xf32>
    %cst_96 = arith.constant 1.600000e+01 : f32
    %212 = vector.broadcast %cst_96 : f32 to vector<16x1xf32>
    %213 = arith.divf %211, %212 : vector<16x1xf32>
    %214 = vector.broadcast %206 : vector<16x1xf32> to vector<16x16xf32>
    %215 = arith.subf %200, %214 : vector<16x16xf32>
    %cst_97 = arith.constant 9.99999974E-6 : f32
    %216 = vector.broadcast %cst_97 : f32 to vector<16x1xf32>
    %217 = arith.addf %213, %216 : vector<16x1xf32>
    %218 = math.rsqrt %217 : vector<16x1xf32>
    %219 = vector.broadcast %218 : vector<16x1xf32> to vector<16x16xf32>
    %220 = arith.mulf %215, %219 : vector<16x16xf32>
    %221 = vector.broadcast %201 : vector<1x16xf32> to vector<16x16xf32>
    %222 = arith.mulf %220, %221 : vector<16x16xf32>
    %223 = vector.broadcast %202 : vector<1x16xf32> to vector<16x16xf32>
    %224 = arith.addf %222, %223 : vector<16x16xf32>
    %c80 = arith.constant 80 : index
    %c0_98 = arith.constant 0 : index
    %225 = vector.load %arg2[%c80, %c0_98] : memref<624x128xf32, #tpu.memory_space<vmem>>, vector<1x16xf32>
    "tpu.trace_start"() <{level = 10 : i32, message = "oc,rc->or"}> : () -> ()
    %cst_99 = arith.constant dense<0.000000e+00> : vector<1x16xf32>
    %226 = tpu.matmul %225, %224, %cst_99 {dimension_numbers = #tpu.dot_dimension_numbers<[1], [1], [0], [0], [0, 0, 1, 0], [], []>} : vector<1x16xf32>, vector<16x16xf32>, vector<1x16xf32> -> vector<1x16xf32>
    "tpu.trace_stop"() : () -> ()
    %c88 = arith.constant 88 : index
    %c0_100 = arith.constant 0 : index
    %227 = vector.load %arg2[%c88, %c0_100] : memref<624x128xf32, #tpu.memory_space<vmem>>, vector<1x1xf32>
    %228 = vector.broadcast %227 : vector<1x1xf32> to vector<1x16xf32>
    %229 = arith.addf %226, %228 : vector<1x16xf32>
    %c0_101 = arith.constant 0 : index
    %c0_102 = arith.constant 0 : index
    %230 = vector.load %arg3[%c0_101, %c0_102] : memref<1x16xf32, #tpu.memory_space<vmem>>, vector<1x16xf32>
    tpu.vector_store %arg3[%c0_101, %c0_102], %229 {strides = array<i32>} : memref<1x16xf32, #tpu.memory_space<vmem>>, vector<1x16xf32>,
    %c72 = arith.constant 72 : index
    %c0_103 = arith.constant 0 : index
    %231 = vector.load %arg2[%c72, %c0_103] : memref<624x128xf32, #tpu.memory_space<vmem>>, vector<2x16xf32>
    "tpu.trace_start"() <{level = 10 : i32, message = "or,br->ob"}> : () -> ()
    %cst_104 = arith.constant dense<0.000000e+00> : vector<1x2xf32>
    %232 = tpu.matmul %229, %231, %cst_104 {dimension_numbers = #tpu.dot_dimension_numbers<[1], [1], [0], [0], [0, 0, 1, 0], [], []>} : vector<1x16xf32>, vector<2x16xf32>, vector<1x2xf32> -> vector<1x2xf32>
    "tpu.trace_stop"() : () -> ()
    %c0_105 = arith.constant 0 : index
    %c0_106 = arith.constant 0 : index
    %233 = vector.load %arg4[%c0_105, %c0_106] : memref<1x2xf32, #tpu.memory_space<vmem>>, vector<1x2xf32>
    tpu.vector_store %arg4[%c0_105, %c0_106], %232 {strides = array<i32>} : memref<1x2xf32, #tpu.memory_space<vmem>>, vector<1x2xf32>,
    return
  }
  func.func @transform_0(%arg0: i32) -> (i32, i32) {
    %c0_i32 = arith.constant 0 : i32
    %c0_i32_0 = arith.constant 0 : i32
    %c0_i32_1 = arith.constant 0 : i32
    return %c0_i32, %c0_i32_0 : i32, i32
  }
  func.func @transform_1(%arg0: i32) -> (i32, i32) {
    %c0_i32 = arith.constant 0 : i32
    %c0_i32_0 = arith.constant 0 : i32
    %c0_i32_1 = arith.constant 0 : i32
    return %c0_i32, %c0_i32_0 : i32, i32
  }
  func.func @transform_2(%arg0: i32) -> (i32, i32) {
    %c0_i32 = arith.constant 0 : i32
    %c0_i32_0 = arith.constant 0 : i32
    %c0_i32_1 = arith.constant 0 : i32
    return %c0_i32, %c0_i32_0 : i32, i32
  }
  func.func @transform_3(%arg0: i32) -> (i32, i32) {
    %c0_i32 = arith.constant 0 : i32
    %c0_i32_0 = arith.constant 0 : i32
    %c0_i32_1 = arith.constant 0 : i32
    return %c0_i32, %c0_i32_0 : i32, i32
  }
}

</mosaic_0001>

<bundles_post_ra>
// kernel: tpu_custom_call.1
= control target key start
LH: loop header
LB: loop body
LE: loop exit
PB: predicated region body
PF: predicated region fallthrough
CT: control target
= control target key end

     0   :  { %9 = vsyncpa [#allocation3], 0  ;;  %s1816_s0 = inlined_call_operand.hbm [shape: f32[16,32], index: 0, kind: input, shape index: {}]   ;;  %s1817_s1 = inlined_call_operand.hbm [shape: f32[624,128], index: 1, kind: input, shape index: {}]   ;;  %s1818_s2 = inlined_call_operand.hbm [shape: f32[1,16], index: 2, kind: output, shape index: {0}]   ;;  %s1819_s3 = inlined_call_operand.hbm [shape: f32[1,2], index: 3, kind: output, shape index: {1}]  }
   0x1   :  { %10 = vsyncpa [#allocation6], 0 }
   0x2   :  { %11 = vsyncpa [#allocation4], 0 }
   0x3   :  { %12 = vsyncpa [#allocation9], 0  ;;  %s17_s14 = sshll.u32 %s1816_s0, 4  ;;  %s1609_s15 = smov [#allocation2]   ;;  %s18_s14 = int_to_ptr.hbm [resolvable:$true] %s17_s14 }
   0x4   :  { %s19_s16 = sshll.u32 %s1609_s15, 4  ;;  %s30_s19 = sshll.u32 %s1817_s1, 4  ;;  %s20_s16 = int_to_ptr.vmem [resolvable:$true] %s19_s16  ;;  %s31_s19 = int_to_ptr.hbm [resolvable:$true] %s30_s19 }
   0x5   :  { %s1610_s20 = smov 128   ;;  %s1611_s21 = smov 8  }
   0x6   :  { %25 = dma.hbm_to_vmem [thread:$0]  %s18_s14, 256, %s20_s16, [#allocation3], %s1610_s20, %s1610_s20, %s1611_s21  }
   0x7   :  { %s1612_s22 = smov [#allocation5]  }
   0x8   :  { %s32_s23 = sshll.u32 %s1612_s22, 4  ;;  %s33_s23 = int_to_ptr.vmem [resolvable:$true] %s32_s23 }
   0x9   :  { %38 = dma.hbm_to_vmem [thread:$0]  %s31_s19, 9984, %s33_s23, [#allocation6], %s1610_s20, %s1610_s20, %s1611_s21  }
   0xa   :  { %1601 = dma.done.wait [#allocation3], 256  }
   0xb   :  { %1602 = vsyncadd [#allocation3], 4294967040 }
   0xc   :  { %1603 = dma.done.wait [#allocation6], 9984  }
   0xd   :  { %1604 = vsyncadd [#allocation6], 4294957312  ;;  %v52_v0 = vld [vmem:[#allocation5 + $0x28] sm:$0xff]  ;;  %v51_v1 = vld [vmem:[#allocation5 + $0x20] sm:$0xff]  ;;  %vm55_vm0 = vcmask 261120   ;;  %vm94_vm1 = vcmask 130048  }
   0xe   :  { %74 = vmatpush.msra.mxu0 %v52_v0  ;;  %v50_v2 = vld [vmem:[#allocation5 + $0x18] sm:$0xff]  ;;  %v49_v3 = vld [vmem:[#allocation5 + $0x10] sm:$0xff]  ;;  %v93_v6 = vld [vmem:[#allocation5 + $0x68] sm:$0xff]  ;;  %vm594_vm9 = vcmask 523264   ;;  %s1615_s0 = smov [#allocation7]   ;;  %s1330_s26 = sshll.u32 %s1818_s2, 4  ;;  %s1331_s26 = int_to_ptr.hbm [resolvable:$true] %s1330_s26 }
   0xf   :  { %v47_v4 = vld [vmem:[#allocation2] sm:$0xff]  ;;  %v48_v5 = vld [vmem:[#allocation2 + $0x8] sm:$0xff]  ;;  %v150_v8 = vld [vmem:[#allocation5 + $0x88] sm:$0xff]  ;;  %1428 = vmatpush.msra.mxu1 %v93_v6  ;;  %s1328_s1 = sshll.u32 %s1615_s0, 4  ;;  %s1616_s27 = smov [#allocation8]   ;;  %s1329_s1 = int_to_ptr.vmem [resolvable:$true] %s1328_s1 }
  0x10   :  { %75 = vmatpush.msra.mxu0 %v51_v1  ;;  %v125_v7 = vld [vmem:[#allocation5 + $0x78] sm:$0xff]  ;;  %165 = vmatpush.msra.mxu3 %v150_v8  ;;  %v92_v9 = vld [vmem:[#allocation5 + $0x60] sm:$0xff]  ;;  %v124_v10 = vld [vmem:[#allocation5 + $0x70] sm:$0xff]  ;;  %s1339_s28 = sshll.u32 %s1616_s27, 4  ;;  %s1341_s4 = sshll.u32 %s1819_s3, 4  ;;  %s1340_s28 = int_to_ptr.vmem [resolvable:$true] %s1339_s28  ;;  %s1342_s4 = int_to_ptr.hbm [resolvable:$true] %s1341_s4 }
  0x11   :  { %140 = vmatpush.msra.mxu2 %v125_v7  ;;  %v149_v11 = vld [vmem:[#allocation5 + $0x80] sm:$0xff]  ;;  %1429 = vmatpush.msra.mxu1 %v92_v9  ;;  %v295_v12 = vld [vmem:[#allocation5 + $0xa8] sm:$0xff]  ;;  %v1440_v14 = vld [vmem:[#allocation5 + $0x30] ss:$0 sm:$0xff] }
  0x12   :  { %76 = vmatpush.msra.mxu0 %v50_v2  ;;  %166 = vmatpush.msra.mxu3 %v149_v11  ;;  %v294_v13 = vld [vmem:[#allocation5 + $0xa0] sm:$0xff]  ;;  %v86_v20 = vld [vmem:[#allocation5 + $0x8] sm:$0xff]  ;;  %v320_v27 = vld [vmem:[#allocation5 + $0xb8] sm:$0xff] }
  0x13   :  { %141 = vmatpush.msra.mxu2 %v124_v10  ;;  %v85_v16 = vld [vmem:[#allocation5] sm:$0xff]  ;;  %v319_v28 = vld [vmem:[#allocation5 + $0xb0] sm:$0xff]  ;;  %v261_v31 = vld [vmem:[#allocation5 + $0x98] sm:$0xff] }
  0x14   :  { %77 = vmatpush.msra.mxu0 %v49_v3  ;;  %v260_v32 = vld [vmem:[#allocation5 + $0x90] sm:$0xff]  ;;  %282 = vmatpush.msrb.mxu3 %v261_v31  ;;  %v1671_v33 = vld [vmem:[#allocation5 + $0x38] sm:$0xff]  ;;  %v1675_v37 = vld [vmem:[#allocation5 + $0x40] sm:$0xff] }
  0x15   :  { %1357 = vmatmul.msk.f32.vlgmr.msra.gmra.mxu0 %vm55_vm0, %v47_v4  ;;  %v345_v53 = vld [vmem:[#allocation5 + $0xc8] sm:$0xff]  ;;  %v344_v54 = vld [vmem:[#allocation5 + $0xc0] sm:$0xff] }
  0x16   :  { %115 = vmatpush.msrb.mxu0 %v93_v6  ;;  %283 = vmatpush.msrb.mxu3 %v260_v32 }
  0x18   :  { %116 = vmatpush.msrb.mxu0 %v92_v9 }
  0x1a   :  { %310 = vmatpush.msra.mxu0 %v295_v12 }
  0x1c   :  { %311 = vmatpush.msra.mxu0 %v294_v13 }
  0x1d   :  { %1358 = vmatmul.msk.f32.gmra.mxu0 %vm55_vm0, %v48_v5 }
  0x92   :  { %v79_v15 = vpop.f32.mrf.mxu0 }
  0x93   :  { %v80_v17 = vadd.f32 %v1440_v14, %v79_v15 }
  0x95   :  { %v1643_v18 = vadd.f32 %v85_v16, %v80_v17 }
  0x97   :  { %1359 = vmatmul.msk.f32.vlgmr.msrb.gmra.mxu0 %vm94_vm1, %v1643_v18  ;;  %1361 = vmatmul.msk.f32.vlgmr.msra.gmra.mxu2 %vm94_vm1, %v1643_v18 }
  0x98   :  { %1363 = vmatmul.msk.f32.vlgmr.msra.gmra.mxu3 %vm94_vm1, %v1643_v18 }
  0x9a   :  { %v82_v19 = vpop.f32.mrf.mxu0 }
  0x9b   :  { %v83_v21 = vadd.f32 %v1440_v14, %v82_v19 }
  0x9d   :  { %v1651_v22 = vadd.f32 %v86_v20, %v83_v21 }
  0x9f   :  { %1360 = vmatmul.msk.f32.vlgmr.msra.gmra.mxu1 %vm94_vm1, %v1651_v22  ;;  %1362 = vmatmul.msk.f32.gmra.mxu2 %vm94_vm1, %v1651_v22 }
  0xa0   :  { %1364 = vmatmul.msk.f32.gmra.mxu3 %vm94_vm1, %v1651_v22  ;;  %1373 = vmatmul.msk.f32.vlgmr.msra.gmra.mxu0 %vm94_vm1, %v1643_v18 }
  0xa8   :  { %1374 = vmatmul.msk.f32.gmra.mxu0 %vm94_vm1, %v1651_v22 }
 0x114   :  { %v118_v29 = vpop.f32.mrf.mxu0 }
 0x11a   :  { %v143_v23 = vpop.f32.mrf.mxu2 }
 0x11b   :  { %v168_v24 = vpop.f32.mrf.mxu3 }
 0x11c   :  { %v121_v30 = vpop.f32.mrf.mxu1 }
 0x11d   :  { %v313_v63 = vpop.f32.mrf.mxu0 }
 0x122   :  { %v146_v25 = vpop.f32.mrf.mxu2 }
 0x123   :  { %v171_v26 = vpop.f32.mrf.mxu3  ;;  %1365 = vmatpush.xpose.msk.msrb.mxu1 %vm94_vm1, %v146_v25 }
 0x124   :  { %251 = vmatpush.msrb.mxu2 %v171_v26 }
 0x125   :  { %v316_v1 = vpop.f32.mrf.mxu0 }
 0x126   :  { %252 = vmatpush.msrb.mxu2 %v168_v24 }
 0x127   :  { %1366 = vmatpush.xpose.msk.msrb.mxu1 %vm94_vm1, %v143_v23  ;;  %v456_v23 = vld [vmem:[#allocation5 + $0xd8] sm:$0xff] }
 0x128   :  { %360 = vmatpush.msra.mxu2 %v345_v53 }
 0x12a   :  { %1367 = vmatmul.msk.f32.vlgmr.msrb.gmra.mxu1 %vm94_vm1, %v118_v29  ;;  %361 = vmatpush.msra.mxu2 %v344_v54 }
 0x12b   :  { %335 = vmatpush.msra.mxu1 %v320_v27 }
 0x12d   :  { %336 = vmatpush.msra.mxu1 %v319_v28 }
 0x12f   :  { %477 = vmatpush.msrb.mxu1 %v456_v23 }
 0x132   :  { %1368 = vmatmul.msk.f32.gmra.mxu1 %vm94_vm1, %v121_v30  ;;  %v455_v30 = vld [vmem:[#allocation5 + $0xd0] sm:$0xff] }
 0x133   :  { %478 = vmatpush.msrb.mxu1 %v455_v30 }
 0x13a   :  { %1375 = vmatmul.msk.f32.vlgmr.msra.gmra.mxu1 %vm94_vm1, %v1643_v18 }
 0x142   :  { %1376 = vmatmul.msk.f32.gmra.mxu1 %vm94_vm1, %v1651_v22 }
 0x1a7   :  { %v203_v34 = vpop.f32.mrf.mxu1 }
 0x1a8   :  { %v204_v35 = vadd.f32 %v203_v34, %v1671_v33  ;;  %v1441_v34 = vld [vmem:[#allocation5 + $0xe0] ss:$0 sm:$0xff] }
 0x1aa   :  { %v209_v36 = vsel %vm94_vm1, %v204_v35, -inf }
 0x1ab   :  { %210 = vmax.xlane.f32.xlu0 %v209_v36 }
 0x1af   :  { %v206_v38 = vpop.f32.mrf.mxu1 }
 0x1b0   :  { %v207_v39 = vadd.f32 %v206_v38, %v1675_v37 }
 0x1b2   :  { %v212_v40 = vsel %vm94_vm1, %v207_v39, -inf }
 0x1b3   :  { %213 = vmax.xlane.f32.xlu0 %v212_v40 }
 0x1b7   :  { %v338_v41 = vpop.f32.mrf.mxu1 }
 0x1bf   :  { %v341_v42 = vpop.f32.mrf.mxu1 }
 0x1c0   :  { %1379 = vmatpush.xpose.msk.msra.mxu3 %vm94_vm1, %v341_v42 }
 0x1c4   :  { %1380 = vmatpush.xpose.msk.msra.mxu3 %vm94_vm1, %v338_v41 }
 0x21e   :  { %v211_v43 = vpop.xlane.xlu0 %210 }
 0x21f   :  { %v215_v44 = vsub.f32 %v204_v35, %v211_v43 }
 0x221   :  { %v217_v45 = vmul.f32 1.442695, %v215_v44 }
 0x223   :  { %1455 = vpow2.f32 %v217_v45 }
 0x226   :  { %v214_v46 = vpop.xlane.xlu0 %213 }
 0x227   :  { %v216_v47 = vsub.f32 %v207_v39, %v214_v46  ;;  %v1613_v46 = vmov 16.0  }
 0x229   :  { %v1456_v48 = vpop.eup %1455  ;;  %v219_v49 = vmul.f32 1.442695, %v216_v47 }
 0x22a   :  { %v221_v50 = vsel %vm94_vm1, %v1456_v48, 0.0 }
 0x22b   :  { %1457 = vpow2.f32 %v219_v49  ;;  %222 = vadd.xlane.f32.xlu1 %v221_v50 }
 0x231   :  { %v1458_v51 = vpop.eup %1457 }
 0x232   :  { %v224_v52 = vsel %vm94_vm1, %v1458_v51, 0.0 }
 0x233   :  { %225 = vadd.xlane.f32.xlu1 %v224_v52 }
 0x29e   :  { %v223_v55 = vpop.xlane.xlu1 %222 }
 0x29f   :  { %1459 = vrcp.f32 %v223_v55 }
 0x2a5   :  { %v1460_v56 = vpop.eup %1459 }
 0x2a6   :  { %v226_v57 = vpop.xlane.xlu1 %225  ;;  %v229_v58 = vmul.f32 %v1460_v56, %v1456_v48 }
 0x2a7   :  { %1461 = vrcp.f32 %v226_v57 }
 0x2a8   :  { %1369 = vmatmul.msk.f32.vlgmr.msrb.gmra.mxu2 %vm94_vm1, %v229_v58 }
 0x2ad   :  { %v1462_v59 = vpop.eup %1461 }
 0x2ae   :  { %v230_v60 = vmul.f32 %v1462_v59, %v1458_v51 }
 0x2b0   :  { %1370 = vmatmul.msk.f32.gmra.mxu2 %vm94_vm1, %v230_v60 }
 0x2b8   :  { %1377 = vmatmul.msk.f32.vlgmr.msra.gmra.mxu2 %vm94_vm1, %v1643_v18 }
 0x2c0   :  { %1378 = vmatmul.msk.f32.gmra.mxu2 %vm94_vm1, %v1651_v22 }
 0x32b   :  { %v254_v61 = vpop.f32.mrf.mxu2 }
 0x32c   :  { %1371 = vmatmul.msk.f32.vlgmr.msrb.gmra.mxu3 %vm94_vm1, %v254_v61  ;;  %v550_v61 = vld [vmem:[#allocation5 + $0x100] sm:$0xff] }
 0x32d   :  { %573 = vmatpush.msrb.mxu2 %v550_v61 }
 0x333   :  { %v257_v62 = vpop.f32.mrf.mxu2 }
 0x334   :  { %1372 = vmatmul.msk.f32.gmra.mxu3 %vm94_vm1, %v257_v62  ;;  %v549_v62 = vld [vmem:[#allocation5 + $0xf8] sm:$0xff] }
 0x335   :  { %574 = vmatpush.msrb.mxu2 %v549_v62 }
 0x33b   :  { %v363_v0 = vpop.f32.mrf.mxu2 }
 0x33c   :  { %1381 = vmatmul.msk.f32.vlgmr.msra.gmra.mxu3 %vm94_vm1, %v313_v63 }
 0x343   :  { %v366_v2 = vpop.f32.mrf.mxu2 }
 0x344   :  { %1382 = vmatmul.msk.f32.gmra.mxu3 %vm94_vm1, %v316_v1  ;;  %446 = vmatpush.msrb.mxu0 %v366_v2  ;;  %v591_v2 = vld [vmem:[#allocation5 + $0x148] sm:$0xff] }
 0x345   :  { %609 = vmatpush.msrb.mxu3 %v591_v2  ;;  %v736_v2 = vld [vmem:[#allocation5 + $0x190] sm:$0xff] }
 0x346   :  { %447 = vmatpush.msrb.mxu0 %v363_v0  ;;  %751 = vmatpush.msra.mxu2 %v736_v2 }
 0x3af   :  { %v285_v3 = vpop.f32.mrf.mxu3 }
 0x3b0   :  { %v292_v35 = vadd.f32 %v1441_v34, %v285_v3  ;;  %v590_v3 = vld [vmem:[#allocation5 + $0x140] sm:$0xff] }
 0x3b1   :  { %610 = vmatpush.msrb.mxu3 %v590_v3  ;;  %v679_v3 = vld [vmem:[#allocation5 + $0x168] sm:$0xff] }
 0x3b7   :  { %v288_v4 = vpop.f32.mrf.mxu3 }
 0x3b8   :  { %v293_v41 = vadd.f32 %v1441_v34, %v288_v4  ;;  %v589_v4 = vld [vmem:[#allocation5 + $0x138] sm:$0xff] }
 0x3b9   :  { %611 = vmatpush.msrb.mxu3 %v589_v4  ;;  %v710_v4 = vld [vmem:[#allocation5 + $0x178] sm:$0xff] }
 0x3bf   :  { %v398_v5 = vpop.f32.mrf.mxu3 }
 0x3c0   :  { %v399_v6 = vadd.f32 %v398_v5, %v1671_v33 }
 0x3c2   :  { %v404_v7 = vsel %vm94_vm1, %v399_v6, -inf }
 0x3c3   :  { %405 = vmax.xlane.f32.xlu2 %v404_v7  ;;  %v588_v7 = vld [vmem:[#allocation5 + $0x130] sm:$0xff] }
 0x3c4   :  { %612 = vmatpush.msrb.mxu3 %v588_v7 }
 0x3c7   :  { %v401_v8 = vpop.f32.mrf.mxu3 }
 0x3c8   :  { %v402_v9 = vadd.f32 %v401_v8, %v1675_v37 }
 0x3ca   :  { %v407_v10 = vsel %vm94_vm1, %v402_v9, -inf }
 0x3cb   :  { %408 = vmax.xlane.f32.xlu2 %v407_v10  ;;  %v587_v10 = vld [vmem:[#allocation5 + $0x128] sm:$0xff] }
 0x3cc   :  { %613 = vmatpush.msrb.mxu3 %v587_v10  ;;  %v880_v10 = vld [vmem:[#allocation5 + $0x1a8] sm:$0xff] }
 0x436   :  { %v406_v11 = vpop.xlane.xlu2 %405 }
 0x437   :  { %v410_v12 = vsub.f32 %v399_v6, %v406_v11 }
 0x439   :  { %v412_v13 = vmul.f32 1.442695, %v410_v12 }
 0x43b   :  { %1463 = vpow2.f32 %v412_v13 }
 0x43e   :  { %v409_v14 = vpop.xlane.xlu2 %408 }
 0x43f   :  { %v411_v15 = vsub.f32 %v402_v9, %v409_v14 }
 0x441   :  { %v1464_v16 = vpop.eup %1463  ;;  %v414_v17 = vmul.f32 1.442695, %v411_v15 }
 0x442   :  { %v416_v19 = vsel %vm94_vm1, %v1464_v16, 0.0 }
 0x443   :  { %1465 = vpow2.f32 %v414_v17  ;;  %417 = vadd.xlane.f32.xlu0 %v416_v19  ;;  %v1442_v19 = vld [vmem:[#allocation5 + $0xe8] ss:$0 sm:$0xff] }
 0x449   :  { %v1466_v20 = vpop.eup %1465 }
 0x44a   :  { %v419_v21 = vsel %vm94_vm1, %v1466_v20, 0.0 }
 0x44b   :  { %420 = vadd.xlane.f32.xlu1 %v419_v21 }
 0x4b6   :  { %v418_v24 = vpop.xlane.xlu0 %417 }
 0x4b7   :  { %1467 = vrcp.f32 %v418_v24  ;;  %v1443_v24 = vld [vmem:[#allocation5 + $0xf0] ss:$0 sm:$0xff] }
 0x4bd   :  { %v1468_v25 = vpop.eup %1467 }
 0x4be   :  { %v424_v26 = vmul.f32 %v1468_v25, %v1464_v16  ;;  %v421_v27 = vpop.xlane.xlu1 %420 }
 0x4bf   :  { %1469 = vrcp.f32 %v421_v27 }
 0x4c0   :  { %1383 = vmatmul.msk.f32.vlgmr.msrb.gmra.mxu0 %vm94_vm1, %v424_v26  ;;  %1471 = vrcp.f32 %v1613_v46  ;;  %v1445_v46 = vld [vmem:[#allocation5 + $0x150] ss:$0 sm:$0xff] }
 0x4c5   :  { %v1470_v28 = vpop.eup %1469 }
 0x4c6   :  { %v425_v29 = vmul.f32 %v1470_v28, %v1466_v20  ;;  %v1472_v47 = vpop.eup %1471 }
 0x4c7   :  { %v499_v48 = vmul.f32 16.0, %v1472_v47  ;;  %vm503_vm2 = vweird.f32 %v1472_v47 }
 0x4c8   :  { %1384 = vmatmul.msk.f32.gmra.mxu0 %vm94_vm1, %v425_v29 }
 0x4c9   :  { %v500_v49 = vsub.f32 1.0, %v499_v48 }
 0x4cb   :  { %v501_v50 = vmul.f32 %v1472_v47, %v500_v49 }
 0x4cd   :  { %v502_v51 = vadd.f32 %v1472_v47, %v501_v50 }
 0x53d   :  { %v449_v31 = vpop.f32.mrf.mxu0 }
 0x53e   :  { %1385 = vmatmul.msk.f32.vlgmr.msrb.gmra.mxu1 %vm94_vm1, %v449_v31 }
 0x545   :  { %v452_v32 = vpop.f32.mrf.mxu0 }
 0x546   :  { %1386 = vmatmul.msk.f32.gmra.mxu1 %vm94_vm1, %v452_v32 }
 0x5bb   :  { %v480_v36 = vpop.f32.mrf.mxu1 }
 0x5bc   :  { %v486_v38 = vadd.f32 %v480_v36, %v292_v35  ;;  %v586_v35 = vld [vmem:[#allocation5 + $0x120] sm:$0xff]  ;;  %v585_v36 = vld [vmem:[#allocation5 + $0x118] sm:$0xff] }
 0x5bd   :  { %614 = vmatpush.msrb.mxu3 %v586_v35 }
 0x5be   :  { %v488_v39 = vadd.f32 %v486_v38, %v1643_v18  ;;  %v1707_v18 = vsel %vm503_vm2, %v1472_v47, %v502_v51  ;;  %v584_v38 = vld [vmem:[#allocation5 + $0x110] sm:$0xff] }
 0x5bf   :  { %615 = vmatpush.msrb.mxu3 %v585_v36 }
 0x5c0   :  { %v492_v40 = vsel %vm94_vm1, %v488_v39, 0.0 }
 0x5c1   :  { %493 = vadd.xlane.f32.xlu2 %v492_v40  ;;  %616 = vmatpush.msrb.mxu3 %v584_v38 }
 0x5c3   :  { %v483_v42 = vpop.f32.mrf.mxu1 }
 0x5c4   :  { %v487_v43 = vadd.f32 %v483_v42, %v293_v41 }
 0x5c6   :  { %v489_v44 = vadd.f32 %v487_v43, %v1651_v22 }
 0x5c8   :  { %v495_v45 = vsel %vm94_vm1, %v489_v44, 0.0 }
 0x5c9   :  { %496 = vadd.xlane.f32.xlu0 %v495_v45 }
 0x634   :  { %v494_v52 = vpop.xlane.xlu2 %493 }
 0x635   :  { %v505_v53 = vmul.f32 %v1707_v18, %v494_v52 }
 0x637   :  { %v507_v54 = vsub.f32 %v488_v39, %v505_v53  ;;  %v1444_v39 = vld [vmem:[#allocation5 + $0x108] ss:$0 sm:$0xff] }
 0x639   :  { %v509_v55 = vmul.f32 %v507_v54, %v507_v54 }
 0x63b   :  { %v511_v22 = vsel %vm94_vm1, %v509_v55, 0.0 }
 0x63c   :  { %512 = vadd.xlane.f32.xlu1 %v511_v22  ;;  %v497_v56 = vpop.xlane.xlu0 %496 }
 0x63d   :  { %v506_v57 = vmul.f32 %v1707_v18, %v497_v56 }
 0x63f   :  { %v508_v58 = vsub.f32 %v489_v44, %v506_v57 }
 0x641   :  { %v510_v59 = vmul.f32 %v508_v58, %v508_v58 }
 0x643   :  { %v514_v60 = vsel %vm94_vm1, %v510_v59, 0.0 }
 0x644   :  { %515 = vadd.xlane.f32.xlu2 %v514_v60 }
 0x6af   :  { %v513_v63 = vpop.xlane.xlu1 %512 }
 0x6b0   :  { %v517_v0 = vmul.f32 %v513_v63, %v1707_v18 }
 0x6b2   :  { %v519_v1 = vadd.f32 1e-05, %v517_v0  ;;  %v711_v0 = vld [vmem:[#allocation5 + $0x180] sm:$0xff] }
 0x6b3   :  { %726 = vmatpush.msra.mxu1 %v711_v0 }
 0x6b4   :  { %1473 = vrsqrt.f32 %v519_v1  ;;  %vm527_vm4 = vweird.f32 %v519_v1 }
 0x6b5   :  { %727 = vmatpush.msra.mxu1 %v710_v4  ;;  %v930_v4 = vld [vmem:[#allocation5 + $0x1c8] sm:$0xff] }
 0x6b7   :  { %v516_v5 = vpop.xlane.xlu2 %515 }
 0x6b8   :  { %v518_v6 = vmul.f32 %v516_v5, %v1707_v18  ;;  %v735_v5 = vld [vmem:[#allocation5 + $0x188] sm:$0xff] }
 0x6b9   :  { %752 = vmatpush.msra.mxu2 %v735_v5 }
 0x6ba   :  { %v1474_v8 = vpop.eup %1473  ;;  %v520_v9 = vadd.f32 1e-05, %v518_v6 }
 0x6bb   :  { %v522_v11 = vmul.f32 %v1474_v8, %v519_v1  ;;  %vm528_vm3 = vweird.f32 %v1474_v8  ;;  %v680_v1 = vld [vmem:[#allocation5 + $0x170] sm:$0xff] }
 0x6bc   :  { %1475 = vrsqrt.f32 %v520_v9  ;;  %vm529_vm5 = vmor %vm527_vm4, %vm528_vm3  ;;  %vm537_vm7 = vweird.f32 %v520_v9  ;;  %701 = vmatpush.msra.mxu0 %v680_v1 }
 0x6bd   :  { %v523_v12 = vmul.f32 %v1474_v8, %v522_v11 }
 0x6be   :  { %702 = vmatpush.msra.mxu0 %v679_v3  ;;  %v931_v3 = vld [vmem:[#allocation5 + $0x1d0] sm:$0xff] }
 0x6bf   :  { %v524_v13 = vmul.f32 0.5, %v523_v12 }
 0x6c1   :  { %v525_v14 = vsub.f32 1.5, %v524_v13 }
 0x6c2   :  { %v1476_v15 = vpop.eup %1475 }
 0x6c3   :  { %v526_v16 = vmul.f32 %v1474_v8, %v525_v14  ;;  %v532_v17 = vmul.f32 %v1476_v15, %v520_v9  ;;  %vm538_vm6 = vweird.f32 %v1476_v15  ;;  %v881_v9 = vld [vmem:[#allocation5 + $0x1b0] sm:$0xff] }
 0x6c4   :  { %vm539_vm8 = vmor %vm537_vm7, %vm538_vm6 }
 0x6c5   :  { %v530_v20 = vsel %vm529_vm5, %v1474_v8, %v526_v16  ;;  %v533_v21 = vmul.f32 %v1476_v15, %v532_v17 }
 0x6c6   :  { %v541_v23 = vmul.f32 %v530_v20, %v507_v54 }
 0x6c7   :  { %v534_v25 = vmul.f32 0.5, %v533_v21 }
 0x6c8   :  { %v544_v26 = vmul.f32 %v1442_v19, %v541_v23 }
 0x6c9   :  { %v535_v27 = vsub.f32 1.5, %v534_v25 }
 0x6ca   :  { %v547_v28 = vadd.f32 %v1443_v24, %v544_v26 }
 0x6cb   :  { %v536_v29 = vmul.f32 %v1476_v15, %v535_v27  ;;  %v1447_v27 = vld [vmem:[#allocation5 + $0x160] ss:$0 sm:$0xff] }
 0x6cc   :  { %1387 = vmatmul.msk.f32.vlgmr.msrb.gmra.mxu2 %vm94_vm1, %v547_v28 }
 0x6cd   :  { %v540_v30 = vsel %vm539_vm8, %v1476_v15, %v536_v29  ;;  %896 = vmatpush.msrb.mxu2 %v881_v9 }
 0x6ce   :  { %v542_v31 = vmul.f32 %v540_v30, %v508_v58 }
 0x6cf   :  { %897 = vmatpush.msrb.mxu2 %v880_v10 }
 0x6d0   :  { %v545_v32 = vmul.f32 %v1442_v19, %v542_v31 }
 0x6d2   :  { %v548_v34 = vadd.f32 %v1443_v24, %v545_v32  ;;  %v1446_v24 = vld [vmem:[#allocation5 + $0x158] ss:$0 sm:$0xff] }
 0x6d4   :  { %1388 = vmatmul.msk.f32.gmra.mxu2 %vm94_vm1, %v548_v34 }
 0x74f   :  { %v576_v40 = vpop.f32.mrf.mxu2 }
 0x750   :  { %v577_v41 = vadd.f32 %v1444_v39, %v576_v40 }
 0x752   :  { %v582_v42 = vmax.f32 %v577_v41, 0.0 }
 0x754   :  { %1389 = vmatmul.msk.f32.vlgmr.msrb.gmra.mxu3 %vm594_vm9, %v582_v42 }
 0x757   :  { %v579_v43 = vpop.f32.mrf.mxu2 }
 0x758   :  { %v580_v44 = vadd.f32 %v1444_v39, %v579_v43  ;;  %v906_v43 = vld [vmem:[#allocation5 + $0x1c0] sm:$0xff] }
 0x75a   :  { %v583_v45 = vmax.f32 %v580_v44, 0.0 }
 0x75c   :  { %1390 = vmatmul.msk.f32.gmra.mxu3 %vm594_vm9, %v583_v45  ;;  %v905_v45 = vld [vmem:[#allocation5 + $0x1b8] sm:$0xff] }
 0x7d7   :  { %v618_v47 = vpop.f32.mrf.mxu3 }
 0x7d8   :  { %v619_v48 = vadd.f32 %v1445_v46, %v618_v47 }
 0x7da   :  { %v624_v49 = vadd.f32 %v619_v48, %v547_v28  ;;  %v847_v48 = vld [vmem:[#allocation5 + $0x1a0] sm:$0xff] }
 0x7db   :  { %868 = vmatpush.msrb.mxu1 %v847_v48 }
 0x7dc   :  { %v628_v50 = vsel %vm94_vm1, %v624_v49, 0.0 }
 0x7dd   :  { %629 = vadd.xlane.f32.xlu0 %v628_v50 }
 0x7df   :  { %v621_v51 = vpop.f32.mrf.mxu3 }
 0x7e0   :  { %v622_v52 = vadd.f32 %v1445_v46, %v621_v51 }
 0x7e2   :  { %v625_v53 = vadd.f32 %v622_v52, %v548_v34 }
 0x7e4   :  { %v631_v54 = vsel %vm94_vm1, %v625_v53, 0.0 }
 0x7e5   :  { %632 = vadd.xlane.f32.xlu1 %v631_v54 }
 0x850   :  { %v630_v55 = vpop.xlane.xlu0 %629 }
 0x851   :  { %v634_v22 = vmul.f32 %v630_v55, %v1707_v18 }
 0x853   :  { %v636_v56 = vsub.f32 %v624_v49, %v634_v22  ;;  %v846_v49 = vld [vmem:[#allocation5 + $0x198] sm:$0xff] }
 0x854   :  { %869 = vmatpush.msrb.mxu1 %v846_v49  ;;  %v1448_v49 = vld [vmem:[#allocation5 + $0x1e8] ss:$0 sm:$0xff] }
 0x855   :  { %v638_v57 = vmul.f32 %v636_v56, %v636_v56 }
 0x857   :  { %v640_v58 = vsel %vm94_vm1, %v638_v57, 0.0 }
 0x858   :  { %v633_v59 = vpop.xlane.xlu1 %632  ;;  %641 = vadd.xlane.f32.xlu2 %v640_v58 }
 0x859   :  { %v635_v60 = vmul.f32 %v633_v59, %v1707_v18 }
 0x85b   :  { %v637_v61 = vsub.f32 %v625_v53, %v635_v60 }
 0x85d   :  { %v639_v62 = vmul.f32 %v637_v61, %v637_v61 }
 0x85f   :  { %v643_v63 = vsel %vm94_vm1, %v639_v62, 0.0 }
 0x860   :  { %644 = vadd.xlane.f32.xlu0 %v643_v63 }
 0x8cb   :  { %v642_v6 = vpop.xlane.xlu2 %641 }
 0x8cc   :  { %v646_v7 = vmul.f32 %v642_v6, %v1707_v18 }
 0x8ce   :  { %v648_v8 = vadd.f32 1e-05, %v646_v7 }
 0x8d0   :  { %1477 = vrsqrt.f32 %v648_v8  ;;  %vm656_vm11 = vweird.f32 %v648_v8 }
 0x8d3   :  { %v645_v11 = vpop.xlane.xlu0 %644 }
 0x8d4   :  { %v647_v12 = vmul.f32 %v645_v11, %v1707_v18 }
 0x8d6   :  { %v1478_v13 = vpop.eup %1477  ;;  %v649_v14 = vadd.f32 1e-05, %v647_v12 }
 0x8d7   :  { %v651_v15 = vmul.f32 %v1478_v13, %v648_v8  ;;  %vm657_vm10 = vweird.f32 %v1478_v13 }
 0x8d8   :  { %1479 = vrsqrt.f32 %v649_v14  ;;  %vm658_vm12 = vmor %vm656_vm11, %vm657_vm10  ;;  %vm666_vm14 = vweird.f32 %v649_v14 }
 0x8d9   :  { %v652_v16 = vmul.f32 %v1478_v13, %v651_v15 }
 0x8db   :  { %v653_v17 = vmul.f32 0.5, %v652_v16 }
 0x8dd   :  { %v654_v19 = vsub.f32 1.5, %v653_v17 }
 0x8de   :  { %v1480_v20 = vpop.eup %1479 }
 0x8df   :  { %v655_v21 = vmul.f32 %v1478_v13, %v654_v19  ;;  %v661_v23 = vmul.f32 %v1480_v20, %v649_v14  ;;  %vm667_vm13 = vweird.f32 %v1480_v20 }
 0x8e0   :  { %vm668_vm15 = vmor %vm666_vm14, %vm667_vm13  ;;  %vm1292_vm13 = vcmask 122880   ;;  %vm1321_vm14 = vcmask 8192  }
 0x8e1   :  { %v659_v25 = vsel %vm658_vm12, %v1478_v13, %v655_v21  ;;  %v662_v26 = vmul.f32 %v1480_v20, %v661_v23 }
 0x8e2   :  { %v670_v28 = vmul.f32 %v659_v25, %v636_v56 }
 0x8e3   :  { %v663_v29 = vmul.f32 0.5, %v662_v26 }
 0x8e4   :  { %v673_v30 = vmul.f32 %v1446_v24, %v670_v28 }
 0x8e5   :  { %v664_v31 = vsub.f32 1.5, %v663_v29 }
 0x8e6   :  { %v1727_v32 = vadd.f32 %v1447_v27, %v673_v30 }
 0x8e7   :  { %v665_v34 = vmul.f32 %v1480_v20, %v664_v31 }
 0x8e8   :  { %1391 = vmatmul.msk.f32.vlgmr.msra.gmra.mxu0 %vm94_vm1, %v1727_v32  ;;  %1393 = vmatmul.msk.f32.vlgmr.msra.gmra.mxu1 %vm94_vm1, %v1727_v32 }
 0x8e9   :  { %v669_v35 = vsel %vm668_vm15, %v1480_v20, %v665_v34  ;;  %1395 = vmatmul.msk.f32.vlgmr.msra.gmra.mxu2 %vm94_vm1, %v1727_v32 }
 0x8ea   :  { %v671_v36 = vmul.f32 %v669_v35, %v637_v61 }
 0x8ec   :  { %v674_v38 = vmul.f32 %v1446_v24, %v671_v36 }
 0x8ee   :  { %v1735_v39 = vadd.f32 %v1447_v27, %v674_v38 }
 0x8f0   :  { %1392 = vmatmul.msk.f32.gmra.mxu0 %vm94_vm1, %v1735_v39  ;;  %1394 = vmatmul.msk.f32.gmra.mxu1 %vm94_vm1, %v1735_v39 }
 0x8f1   :  { %1396 = vmatmul.msk.f32.gmra.mxu2 %vm94_vm1, %v1735_v39 }
 0x8f9   :  { %1405 = vmatmul.msk.f32.vlgmr.msrb.gmra.mxu2 %vm94_vm1, %v1727_v32 }
 0x901   :  { %1406 = vmatmul.msk.f32.gmra.mxu2 %vm94_vm1, %v1735_v39 }
 0x965   :  { %v729_v40 = vpop.f32.mrf.mxu1  ;;  %v704_v44 = vpop.f32.mrf.mxu0 }
 0x96c   :  { %v754_v41 = vpop.f32.mrf.mxu2 }
 0x96d   :  { %v732_v42 = vpop.f32.mrf.mxu1  ;;  %v707_v47 = vpop.f32.mrf.mxu0 }
 0x96e   :  { %1397 = vmatpush.xpose.msk.msra.mxu3 %vm94_vm1, %v732_v42 }
 0x972   :  { %1398 = vmatpush.xpose.msk.msra.mxu3 %vm94_vm1, %v729_v40 }
 0x974   :  { %v757_v46 = vpop.f32.mrf.mxu2 }
 0x975   :  { %837 = vmatpush.msrb.mxu0 %v757_v46  ;;  %1399 = vmatmul.msk.f32.vlgmr.msra.gmra.mxu3 %vm94_vm1, %v704_v44  ;;  %v1041_v46 = vld [vmem:[#allocation5 + $0x1d8] sm:$0xff] }
 0x976   :  { %921 = vmatpush.msrb.mxu3 %v906_v43 }
 0x977   :  { %838 = vmatpush.msrb.mxu0 %v754_v41 }
 0x978   :  { %922 = vmatpush.msrb.mxu3 %v905_v45 }
 0x979   :  { %946 = vmatpush.msra.mxu0 %v931_v3 }
 0x97b   :  { %947 = vmatpush.msra.mxu0 %v930_v4  ;;  %v1128_v4 = vld [vmem:[#allocation5 + $0x200] sm:$0xff] }
 0x97c   :  { %v899_v13 = vpop.f32.mrf.mxu2 }
 0x97d   :  { %1400 = vmatmul.msk.f32.gmra.mxu3 %vm94_vm1, %v707_v47 }
 0x984   :  { %v902_v15 = vpop.f32.mrf.mxu2 }
 0x985   :  { %1407 = vmatmul.msk.f32.vlgmr.msrb.gmra.mxu3 %vm94_vm1, %v1727_v32 }
 0x98d   :  { %1408 = vmatmul.msk.f32.gmra.mxu3 %vm94_vm1, %v1735_v39 }
 0x9f8   :  { %v789_v50 = vpop.f32.mrf.mxu3 }
 0x9f9   :  { %v790_v51 = vadd.f32 %v789_v50, %v1671_v33 }
 0x9fb   :  { %v795_v52 = vsel %vm94_vm1, %v790_v51, -inf }
 0x9fc   :  { %796 = vmax.xlane.f32.xlu1 %v795_v52 }
 0xa00   :  { %v792_v53 = vpop.f32.mrf.mxu3 }
 0xa01   :  { %v793_v54 = vadd.f32 %v792_v53, %v1675_v37 }
 0xa03   :  { %v798_v55 = vsel %vm94_vm1, %v793_v54, -inf }
 0xa04   :  { %799 = vmax.xlane.f32.xlu2 %v798_v55 }
 0xa08   :  { %v924_v22 = vpop.f32.mrf.mxu3 }
 0xa10   :  { %v927_v56 = vpop.f32.mrf.mxu3 }
 0xa11   :  { %1411 = vmatpush.xpose.msk.msra.mxu1 %vm94_vm1, %v927_v56 }
 0xa15   :  { %1412 = vmatpush.xpose.msk.msra.mxu1 %vm94_vm1, %v924_v22 }
 0xa6f   :  { %v797_v57 = vpop.xlane.xlu1 %796 }
 0xa70   :  { %v801_v58 = vsub.f32 %v790_v51, %v797_v57 }
 0xa72   :  { %v803_v59 = vmul.f32 1.442695, %v801_v58 }
 0xa74   :  { %1481 = vpow2.f32 %v803_v59 }
 0xa77   :  { %v800_v60 = vpop.xlane.xlu2 %799 }
 0xa78   :  { %v802_v61 = vsub.f32 %v793_v54, %v800_v60 }
 0xa7a   :  { %v1482_v62 = vpop.eup %1481  ;;  %v805_v63 = vmul.f32 1.442695, %v802_v61 }
 0xa7b   :  { %v807_v0 = vsel %vm94_vm1, %v1482_v62, 0.0 }
 0xa7c   :  { %1483 = vpow2.f32 %v805_v63  ;;  %808 = vadd.xlane.f32.xlu0 %v807_v0 }
 0xa82   :  { %v1484_v1 = vpop.eup %1483 }
 0xa83   :  { %v810_v2 = vsel %vm94_vm1, %v1484_v1, 0.0 }
 0xa84   :  { %811 = vadd.xlane.f32.xlu1 %v810_v2 }
 0xaef   :  { %v809_v5 = vpop.xlane.xlu0 %808 }
 0xaf0   :  { %1485 = vrcp.f32 %v809_v5 }
 0xaf6   :  { %v1486_v6 = vpop.eup %1485 }
 0xaf7   :  { %v815_v7 = vmul.f32 %v1486_v6, %v1482_v62  ;;  %v812_v8 = vpop.xlane.xlu1 %811 }
 0xaf8   :  { %1487 = vrcp.f32 %v812_v8  ;;  %v1170_v8 = vld [vmem:[#allocation5 + $0x250] sm:$0xff] }
 0xaf9   :  { %1401 = vmatmul.msk.f32.vlgmr.msrb.gmra.mxu0 %vm94_vm1, %v815_v7 }
 0xafe   :  { %v1488_v9 = vpop.eup %1487 }
 0xaff   :  { %v816_v10 = vmul.f32 %v1488_v9, %v1484_v1  ;;  %v1169_v9 = vld [vmem:[#allocation5 + $0x248] sm:$0xff] }
 0xb01   :  { %1402 = vmatmul.msk.f32.gmra.mxu0 %vm94_vm1, %v816_v10  ;;  %v1168_v10 = vld [vmem:[#allocation5 + $0x240] sm:$0xff] }
 0xb09   :  { %1409 = vmatmul.msk.f32.vlgmr.msra.gmra.mxu0 %vm94_vm1, %v1727_v32 }
 0xb11   :  { %1410 = vmatmul.msk.f32.gmra.mxu0 %vm94_vm1, %v1735_v39 }
 0xb76   :  { %v840_v11 = vpop.f32.mrf.mxu0 }
 0xb77   :  { %1403 = vmatmul.msk.f32.vlgmr.msrb.gmra.mxu1 %vm94_vm1, %v840_v11 }
 0xb78   :  { %1187 = vmatpush.msrb.mxu1 %v1170_v8 }
 0xb7a   :  { %1188 = vmatpush.msrb.mxu1 %v1169_v9 }
 0xb7c   :  { %1189 = vmatpush.msrb.mxu1 %v1168_v10 }
 0xb7e   :  { %v843_v12 = vpop.f32.mrf.mxu0 }
 0xb7f   :  { %1404 = vmatmul.msk.f32.gmra.mxu1 %vm94_vm1, %v843_v12 }
 0xb86   :  { %v949_v14 = vpop.f32.mrf.mxu0 }
 0xb87   :  { %1413 = vmatmul.msk.f32.vlgmr.msra.gmra.mxu1 %vm94_vm1, %v899_v13  ;;  %v1167_v13 = vld [vmem:[#allocation5 + $0x238] sm:$0xff] }
 0xb88   :  { %1190 = vmatpush.msrb.mxu1 %v1167_v13  ;;  %v1294_v13 = vld [vmem:[#allocation5 + $0x48] sm:$0x3] }
 0xb8e   :  { %v952_v16 = vpop.f32.mrf.mxu0 }
 0xb8f   :  { %1414 = vmatmul.msk.f32.gmra.mxu1 %vm94_vm1, %v902_v15  ;;  %1032 = vmatpush.msra.mxu2 %v952_v16  ;;  %v1166_v16 = vld [vmem:[#allocation5 + $0x230] sm:$0xff] }
 0xb90   :  { %1191 = vmatpush.msrb.mxu1 %v1166_v16 }
 0xb91   :  { %1033 = vmatpush.msra.mxu2 %v949_v14 }
 0xbf4   :  { %v871_v17 = vpop.f32.mrf.mxu1 }
 0xbf5   :  { %v878_v50 = vadd.f32 %v1448_v49, %v871_v17 }
 0xbfc   :  { %v874_v19 = vpop.f32.mrf.mxu1 }
 0xbfd   :  { %v879_v55 = vadd.f32 %v1448_v49, %v874_v19 }
 0xc04   :  { %v984_v20 = vpop.f32.mrf.mxu1 }
 0xc05   :  { %v985_v21 = vadd.f32 %v984_v20, %v1671_v33 }
 0xc07   :  { %v990_v23 = vsel %vm94_vm1, %v985_v21, -inf }
 0xc08   :  { %991 = vmax.xlane.f32.xlu2 %v990_v23 }
 0xc0c   :  { %v987_v24 = vpop.f32.mrf.mxu1 }
 0xc0d   :  { %v988_v25 = vadd.f32 %v987_v24, %v1675_v37  ;;  %v1042_v37 = vld [vmem:[#allocation5 + $0x1e0] sm:$0xff] }
 0xc0e   :  { %1063 = vmatpush.msra.mxu3 %v1042_v37 }
 0xc0f   :  { %v993_v26 = vsel %vm94_vm1, %v988_v25, -inf }
 0xc10   :  { %994 = vmax.xlane.f32.xlu0 %v993_v26  ;;  %1064 = vmatpush.msra.mxu3 %v1041_v46  ;;  %v1449_v26 = vld [vmem:[#allocation5 + $0x1f0] ss:$0 sm:$0xff] }
 0xc12   :  { %1426 = vmatpush.xpose.msk.msrb.mxu3 %vm94_vm1, %v1294_v13 }
 0xc7b   :  { %v992_v27 = vpop.xlane.xlu2 %991 }
 0xc7c   :  { %v996_v28 = vsub.f32 %v985_v21, %v992_v27 }
 0xc7e   :  { %v998_v29 = vmul.f32 1.442695, %v996_v28 }
 0xc80   :  { %1489 = vpow2.f32 %v998_v29 }
 0xc83   :  { %v995_v30 = vpop.xlane.xlu0 %994 }
 0xc84   :  { %v997_v31 = vsub.f32 %v988_v25, %v995_v30  ;;  %v1450_v30 = vld [vmem:[#allocation5 + $0x1f8] ss:$0 sm:$0xff] }
 0xc86   :  { %v1490_v34 = vpop.eup %1489  ;;  %v1000_v35 = vmul.f32 1.442695, %v997_v31 }
 0xc87   :  { %v1002_v36 = vsel %vm94_vm1, %v1490_v34, 0.0 }
 0xc88   :  { %1491 = vpow2.f32 %v1000_v35  ;;  %1003 = vadd.xlane.f32.xlu1 %v1002_v36 }
 0xc8e   :  { %v1492_v33 = vpop.eup %1491 }
 0xc8f   :  { %v1005_v38 = vsel %vm94_vm1, %v1492_v33, 0.0 }
 0xc90   :  { %1006 = vadd.xlane.f32.xlu2 %v1005_v38 }
 0xcfb   :  { %v1004_v40 = vpop.xlane.xlu1 %1003 }
 0xcfc   :  { %1493 = vrcp.f32 %v1004_v40 }
 0xd02   :  { %v1494_v41 = vpop.eup %1493 }
 0xd03   :  { %v1010_v42 = vmul.f32 %v1494_v41, %v1490_v34  ;;  %v1007_v43 = vpop.xlane.xlu2 %1006 }
 0xd04   :  { %1495 = vrcp.f32 %v1007_v43  ;;  %v1164_v43 = vld [vmem:[#allocation5 + $0x220] sm:$0xff] }
 0xd05   :  { %1415 = vmatmul.msk.f32.vlgmr.msra.gmra.mxu2 %vm94_vm1, %v1010_v42  ;;  %v1165_v42 = vld [vmem:[#allocation5 + $0x228] sm:$0xff] }
 0xd06   :  { %1192 = vmatpush.msrb.mxu1 %v1165_v42 }
 0xd08   :  { %1193 = vmatpush.msrb.mxu1 %v1164_v43 }
 0xd0a   :  { %v1496_v44 = vpop.eup %1495 }
 0xd0b   :  { %v1011_v45 = vmul.f32 %v1496_v44, %v1492_v33  ;;  %v1163_v44 = vld [vmem:[#allocation5 + $0x218] sm:$0xff] }
 0xd0c   :  { %1194 = vmatpush.msrb.mxu1 %v1163_v44 }
 0xd0d   :  { %1416 = vmatmul.msk.f32.gmra.mxu2 %vm94_vm1, %v1011_v45  ;;  %v1451_v45 = vld [vmem:[#allocation5 + $0x210] ss:$0 sm:$0xff] }
 0xd88   :  { %v1035_v47 = vpop.f32.mrf.mxu2 }
 0xd89   :  { %1417 = vmatmul.msk.f32.vlgmr.msra.gmra.mxu3 %vm94_vm1, %v1035_v47 }
 0xd90   :  { %v1038_v48 = vpop.f32.mrf.mxu2 }
 0xd91   :  { %1418 = vmatmul.msk.f32.gmra.mxu3 %vm94_vm1, %v1038_v48 }
 0xe0c   :  { %v1066_v51 = vpop.f32.mrf.mxu3 }
 0xe0d   :  { %v1072_v52 = vadd.f32 %v1066_v51, %v878_v50 }
 0xe0f   :  { %v1074_v53 = vadd.f32 %v1072_v52, %v1727_v32  ;;  %v1452_v52 = vld [vmem:[#allocation5 + $0x258] ss:$0 sm:$0xff] }
 0xe11   :  { %v1078_v54 = vsel %vm94_vm1, %v1074_v53, 0.0 }
 0xe12   :  { %1079 = vadd.xlane.f32.xlu0 %v1078_v54 }
 0xe14   :  { %v1069_v22 = vpop.f32.mrf.mxu3 }
 0xe15   :  { %v1073_v56 = vadd.f32 %v1069_v22, %v879_v55 }
 0xe17   :  { %v1075_v57 = vadd.f32 %v1073_v56, %v1735_v39  ;;  %v1129_v39 = vld [vmem:[#allocation5 + $0x208] sm:$0xff] }
 0xe18   :  { %1152 = vmatpush.msrb.mxu0 %v1129_v39 }
 0xe19   :  { %v1081_v58 = vsel %vm94_vm1, %v1075_v57, 0.0 }
 0xe1a   :  { %1082 = vadd.xlane.f32.xlu1 %v1081_v58  ;;  %1153 = vmatpush.msrb.mxu0 %v1128_v4 }
 0xe85   :  { %v1080_v59 = vpop.xlane.xlu0 %1079 }
 0xe86   :  { %v1084_v60 = vmul.f32 %v1080_v59, %v1707_v18 }
 0xe88   :  { %v1086_v61 = vsub.f32 %v1074_v53, %v1084_v60 }
 0xe8a   :  { %v1088_v62 = vmul.f32 %v1086_v61, %v1086_v61 }
 0xe8c   :  { %v1090_v63 = vsel %vm94_vm1, %v1088_v62, 0.0 }
 0xe8d   :  { %1091 = vadd.xlane.f32.xlu2 %v1090_v63  ;;  %v1083_v32 = vpop.xlane.xlu1 %1082 }
 0xe8e   :  { %v1085_v0 = vmul.f32 %v1083_v32, %v1707_v18 }
 0xe90   :  { %v1087_v1 = vsub.f32 %v1075_v57, %v1085_v0 }
 0xe92   :  { %v1089_v2 = vmul.f32 %v1087_v1, %v1087_v1 }
 0xe94   :  { %v1093_v3 = vsel %vm94_vm1, %v1089_v2, 0.0 }
 0xe95   :  { %1094 = vadd.xlane.f32.xlu0 %v1093_v3 }
 0xf00   :  { %v1092_v5 = vpop.xlane.xlu2 %1091 }
 0xf01   :  { %v1096_v6 = vmul.f32 %v1092_v5, %v1707_v18 }
 0xf03   :  { %v1098_v7 = vadd.f32 1e-05, %v1096_v6 }
 0xf05   :  { %1497 = vrsqrt.f32 %v1098_v7  ;;  %vm1106_vm2 = vweird.f32 %v1098_v7 }
 0xf08   :  { %v1095_v11 = vpop.xlane.xlu0 %1094 }
 0xf09   :  { %v1097_v12 = vmul.f32 %v1095_v11, %v1707_v18 }
 0xf0b   :  { %v1498_v14 = vpop.eup %1497  ;;  %v1099_v15 = vadd.f32 1e-05, %v1097_v12  ;;  %v1257_v12 = vld [vmem:[#allocation5 + $0x58] sm:$0x1] }
 0xf0c   :  { %v1101_v17 = vmul.f32 %v1498_v14, %v1098_v7  ;;  %vm1107_vm0 = vweird.f32 %v1498_v14 }
 0xf0d   :  { %1499 = vrsqrt.f32 %v1099_v15  ;;  %vm1108_vm3 = vmor %vm1106_vm2, %vm1107_vm0  ;;  %vm1116_vm5 = vweird.f32 %v1099_v15 }
 0xf0e   :  { %v1102_v19 = vmul.f32 %v1498_v14, %v1101_v17 }
 0xf10   :  { %v1103_v20 = vmul.f32 0.5, %v1102_v19 }
 0xf12   :  { %v1104_v21 = vsub.f32 1.5, %v1103_v20 }
 0xf13   :  { %v1500_v23 = vpop.eup %1499 }
 0xf14   :  { %v1105_v24 = vmul.f32 %v1498_v14, %v1104_v21  ;;  %v1111_v25 = vmul.f32 %v1500_v23, %v1099_v15  ;;  %vm1117_vm4 = vweird.f32 %v1500_v23 }
 0xf15   :  { %vm1118_vm6 = vmor %vm1116_vm5, %vm1117_vm4 }
 0xf16   :  { %v1109_v27 = vsel %vm1108_vm3, %v1498_v14, %v1105_v24  ;;  %v1112_v28 = vmul.f32 %v1500_v23, %v1111_v25  ;;  %v1614_v14 = vmov 0  }
 0xf17   :  { %v1120_v29 = vmul.f32 %v1109_v27, %v1086_v61  ;;  %1438 = vset.pattern.permute.xlu2 %v1614_v14  ;;  %1439 = vset.pattern.permute.xlu0 %v1614_v14 }
 0xf18   :  { %v1113_v31 = vmul.f32 0.5, %v1112_v28 }
 0xf19   :  { %v1123_v34 = vmul.f32 %v1449_v26, %v1120_v29  ;;  %v1453_v29 = vld [vmem:[#allocation5 + $0x260] ss:$0 sm:$0xff] }
 0xf1a   :  { %v1114_v35 = vsub.f32 1.5, %v1113_v31 }
 0xf1b   :  { %v1126_v36 = vadd.f32 %v1450_v30, %v1123_v34  ;;  %v1454_v34 = vld [vmem:[#allocation5 + $0x268] ss:$0 sm:$0xff] }
 0xf1c   :  { %v1115_v33 = vmul.f32 %v1500_v23, %v1114_v35 }
 0xf1d   :  { %1419 = vmatmul.msk.f32.vlgmr.msrb.gmra.mxu0 %vm94_vm1, %v1126_v36 }
 0xf1e   :  { %v1119_v38 = vsel %vm1118_vm6, %v1500_v23, %v1115_v33 }
 0xf1f   :  { %v1121_v37 = vmul.f32 %v1119_v38, %v1087_v1  ;;  %v1256_v38 = vld [vmem:[#allocation5 + $0x50] sm:$0x1] }
 0xf21   :  { %v1124_v40 = vmul.f32 %v1449_v26, %v1121_v37 }
 0xf23   :  { %v1127_v41 = vadd.f32 %v1450_v30, %v1124_v40 }
 0xf25   :  { %1420 = vmatmul.msk.f32.gmra.mxu0 %vm94_vm1, %v1127_v41 }
 0xf9a   :  { %v1155_v46 = vpop.f32.mrf.mxu0 }
 0xf9b   :  { %v1156_v47 = vadd.f32 %v1451_v45, %v1155_v46 }
 0xf9d   :  { %v1161_v48 = vmax.f32 %v1156_v47, 0.0 }
 0xf9f   :  { %1421 = vmatmul.msk.f32.vlgmr.msrb.gmra.mxu1 %vm594_vm9, %v1161_v48 }
 0xfa2   :  { %v1158_v49 = vpop.f32.mrf.mxu0 }
 0xfa3   :  { %v1159_v50 = vadd.f32 %v1451_v45, %v1158_v49 }
 0xfa5   :  { %v1162_v51 = vmax.f32 %v1159_v50, 0.0 }
 0xfa7   :  { %1422 = vmatmul.msk.f32.gmra.mxu1 %vm594_vm9, %v1162_v51 }
0x101c   :  { %v1196_v53 = vpop.f32.mrf.mxu1 }
0x101d   :  { %v1197_v54 = vadd.f32 %v1452_v52, %v1196_v53 }
0x101f   :  { %v1202_v55 = vadd.f32 %v1197_v54, %v1126_v36 }
0x1021   :  { %v1206_v22 = vsel %vm94_vm1, %v1202_v55, 0.0 }
0x1022   :  { %1207 = vadd.xlane.f32.xlu2 %v1206_v22 }
0x1024   :  { %v1199_v56 = vpop.f32.mrf.mxu1 }
0x1025   :  { %v1200_v57 = vadd.f32 %v1452_v52, %v1199_v56 }
0x1027   :  { %v1203_v58 = vadd.f32 %v1200_v57, %v1127_v41 }
0x1029   :  { %v1209_v59 = vsel %vm94_vm1, %v1203_v58, 0.0 }
0x102a   :  { %1210 = vadd.xlane.f32.xlu1 %v1209_v59 }
0x103a   :  { %1260 = vperm.xlu2 %1438, %v1257_v12  }
0x1095   :  { %v1208_v60 = vpop.xlane.xlu2 %1207 }
0x1096   :  { %v1212_v61 = vmul.f32 %v1208_v60, %v1707_v18 }
0x1098   :  { %v1214_v62 = vsub.f32 %v1202_v55, %v1212_v61 }
0x109a   :  { %v1216_v63 = vmul.f32 %v1214_v62, %v1214_v62 }
0x109c   :  { %v1218_v32 = vsel %vm94_vm1, %v1216_v63, 0.0 }
0x109d   :  { %1219 = vadd.xlane.f32.xlu1 %v1218_v32  ;;  %v1211_v0 = vpop.xlane.xlu1 %1210  ;;  %v1261_v37 = vpop.permute.xlu2 %1260 }
0x109e   :  { %v1213_v1 = vmul.f32 %v1211_v0, %v1707_v18 }
0x10a0   :  { %v1215_v2 = vsub.f32 %v1203_v58, %v1213_v1 }
0x10a2   :  { %v1217_v3 = vmul.f32 %v1215_v2, %v1215_v2 }
0x10a4   :  { %v1221_v39 = vsel %vm94_vm1, %v1217_v3, 0.0 }
0x10a5   :  { %1222 = vadd.xlane.f32.xlu0 %v1221_v39 }
0x1110   :  { %v1220_v4 = vpop.xlane.xlu1 %1219 }
0x1111   :  { %v1224_v5 = vmul.f32 %v1220_v4, %v1707_v18 }
0x1113   :  { %v1226_v6 = vadd.f32 1e-05, %v1224_v5 }
0x1115   :  { %1501 = vrsqrt.f32 %v1226_v6  ;;  %vm1234_vm8 = vweird.f32 %v1226_v6 }
0x1118   :  { %v1223_v7 = vpop.xlane.xlu0 %1222 }
0x1119   :  { %v1225_v8 = vmul.f32 %v1223_v7, %v1707_v18 }
0x111b   :  { %v1502_v9 = vpop.eup %1501  ;;  %v1227_v10 = vadd.f32 1e-05, %v1225_v8 }
0x111c   :  { %v1229_v11 = vmul.f32 %v1502_v9, %v1226_v6  ;;  %vm1235_vm7 = vweird.f32 %v1502_v9 }
0x111d   :  { %1503 = vrsqrt.f32 %v1227_v10  ;;  %vm1236_vm10 = vmor %vm1234_vm8, %vm1235_vm7  ;;  %vm1244_vm11 = vweird.f32 %v1227_v10 }
0x111e   :  { %v1230_v15 = vmul.f32 %v1502_v9, %v1229_v11 }
0x1120   :  { %v1231_v16 = vmul.f32 0.5, %v1230_v15 }
0x1122   :  { %v1232_v19 = vsub.f32 1.5, %v1231_v16 }
0x1123   :  { %v1504_v17 = vpop.eup %1503 }
0x1124   :  { %v1239_v20 = vmul.f32 %v1504_v17, %v1227_v10  ;;  %v1233_v23 = vmul.f32 %v1502_v9, %v1232_v19  ;;  %vm1245_vm9 = vweird.f32 %v1504_v17 }
0x1125   :  { %vm1246_vm12 = vmor %vm1244_vm11, %vm1245_vm9 }
0x1126   :  { %v1240_v21 = vmul.f32 %v1504_v17, %v1239_v20  ;;  %v1237_v25 = vsel %vm1236_vm10, %v1502_v9, %v1233_v23 }
0x1127   :  { %v1248_v28 = vmul.f32 %v1237_v25, %v1214_v62 }
0x1128   :  { %v1241_v18 = vmul.f32 0.5, %v1240_v21 }
0x1129   :  { %v1251_v36 = vmul.f32 %v1453_v29, %v1248_v28 }
0x112a   :  { %v1242_v24 = vsub.f32 1.5, %v1241_v18 }
0x112b   :  { %v1254_v33 = vadd.f32 %v1454_v34, %v1251_v36 }
0x112c   :  { %v1243_v26 = vmul.f32 %v1504_v17, %v1242_v24 }
0x112e   :  { %v1247_v27 = vsel %vm1246_vm12, %v1504_v17, %v1243_v26 }
0x112f   :  { %v1249_v30 = vmul.f32 %v1247_v27, %v1215_v2 }
0x1131   :  { %v1252_v31 = vmul.f32 %v1453_v29, %v1249_v30 }
0x1133   :  { %v1255_v35 = vadd.f32 %v1454_v34, %v1252_v31 }
0x1135   :  { %1423 = vmatpush.xpose.msk.msrb.mxu2 %vm94_vm1, %v1255_v35 }
0x1139   :  { %1424 = vmatpush.xpose.msk.msrb.mxu2 %vm94_vm1, %v1254_v33 }
0x113c   :  { %1425 = vmatmul.msk.f32.vlgmr.msrb.gmra.mxu2 %vm94_vm1, %v1256_v38 }
0x11bf   :  { %v1289_v40 = vpop.f32.mrf.mxu2 }
0x11c0   :  { %v1290_v41 = vadd.f32 %v1289_v40, %v1261_v37 }
0x11c2   :  { %1427 = vmatmul.msk.f32.vlgmr.msrb.gmra.mxu3 %vm94_vm1, %v1290_v41  ;;  %1293 = vst.msk [vmem:[#allocation7] sm:$0x1] %vm1292_vm13, %v1290_v41 }
0x11c3   :  { %1333 = dma.vmem_to_hbm [thread:$0]  %s1329_s1, 16, %s1331_s26, [#allocation4]  }
0x1245   :  { %v1318_v42 = vpop.f32.mrf.mxu3 }
0x1246   :  { %1322 = vst.msk [vmem:[#allocation8] sm:$0x1] %vm1321_vm14, %v1318_v42 }
0x1247   :  { %1344 = dma.vmem_to_hbm [thread:$0]  %s1340_s28, 16, %s1342_s4, [#allocation9]  }
0x1248   :  { %1605 = dma.done.wait [#allocation4], 16  }
0x1249   :  { %1606 = vsyncadd [#allocation4], 4294967280 }
0x124a   :  { %1607 = dma.done.wait [#allocation9], 16  }
0x124b   :  { %1608 = vsyncadd [#allocation9], 4294967280 }
0x124c   :  { %1353 = vsyncpa [#allocation3], 1 }
0x124d   :  { %1354 = vsyncpa [#allocation6], 1 }
0x124e   :  { %1355 = vsyncpa [#allocation4], 1 }
0x124f   :  { %1356 = vsyncpa [#allocation9], 1 }

</bundles_post_ra>
